<compile_context>
chip_gen: v6e
topology: v6e:2x2x1
jax: 0.10.0
libtpu: 0.0.40
codegen_flags: <defaults>
</compile_context>

<pallas_src>
import functools
import math

import jax
import jax.numpy as jnp
from jax import lax
from jax.experimental import pallas as pl
from jax.experimental.pallas import tpu as pltpu


# Fixed upper bound on the eps-annealing schedule length (geomloss generates
# ~100 steps for blur=1e-3, scaling=0.9 at O(10) diameters; 256 covers
# diameters up to ~4e8 before truncation).
MAX_STEPS = 256


def _sus_sinkhorn_kernel(nstep_ref, eps_ref, inveps_ref, damp_ref,
                         x_ref, yT_ref, y2_ref, out_ref, *,
                         rho_y, eps_target):
    """Semi-unbalanced Sinkhorn OT loss for one pair of point clouds, fully in VMEM.

    rho_x = None (balanced / hard constraint on the synth marginal),
    rho_y = reach**p (soft KL penalty on the stored input marginal).
    """
    x = x_ref[...]                                   # (N, D) f32
    yT = yT_ref[...]                                 # (D, M) f32  (pre-transposed)
    y2 = y2_ref[...]                                 # (1, M) f32  (precomputed ||y_j||^2)
    N = x.shape[0]
    M = yT.shape[1]

    # C[i, j] = ||x_i - y_j||^2 / 2   (p = 2 cost; cross term on the MXU)
    x2 = jnp.sum(x * x, axis=1, keepdims=True)                       # (N, 1)
    xy = lax.dot_general(x, yT, (((1,), (0,)), ((), ())),
                         preferred_element_type=jnp.float32)         # (N, M)
    C = 0.5 * (x2 - 2.0 * xy + y2)                                   # (N, M)

    a_log = -math.log(N)          # uniform weights a_i = 1/N
    b_log = -math.log(M)          # uniform weights b_j = 1/M

    def lse_rows(s):              # (N, M) -> (N, 1)
        m = jnp.max(s, axis=1, keepdims=True)
        return m + jnp.log(jnp.sum(jnp.exp(s - m), axis=1, keepdims=True))

    def lse_cols(s):              # (N, M) -> (1, M)
        m = jnp.max(s, axis=0, keepdims=True)
        return m + jnp.log(jnp.sum(jnp.exp(s - m), axis=0, keepdims=True))

    # --- initialization at eps_list[0] (= diameter**p) ---
    eps0 = eps_ref[0]
    inv0 = inveps_ref[0]
    damp0 = damp_ref[0]
    nC0 = C * (-inv0)                                                # shared scaled cost
    f = (-eps0) * lse_rows(b_log + nC0)                              # (N, 1)
    g = damp0 * ((-eps0) * lse_cols(a_log + nC0))                    # (1, M)

    # --- epsilon-scaling symmetric (Jacobi) Sinkhorn iterations ---
    n_steps = nstep_ref[0]

    def body(i, carry):
        f, g = carry
        eps = eps_ref[i]          # per-step scalars precomputed host/device-side
        inv = inveps_ref[i]
        damp = damp_ref[i]
        nC = C * (-inv)           # ONE shared N x M multiply per step (no divides)
        ft = (-eps) * lse_rows((b_log + g * inv) + nC)
        gt = damp * ((-eps) * lse_cols((a_log + f * inv) + nC))
        return 0.5 * (f + ft), 0.5 * (g + gt)

    f, g = lax.fori_loop(0, n_steps, body, (f, g))

    # --- last extrapolation at the target eps = blur**p (compile-time constant) ---
    inv_t = 1.0 / eps_target
    damp_t = 1.0 / (1.0 + eps_target / rho_y)
    nCt = C * (-inv_t)
    f_new = (-eps_target) * lse_rows((b_log + g * inv_t) + nCt)
    g_new = damp_t * ((-eps_target) * lse_cols((a_log + f * inv_t) + nCt))

    # --- sinkhorn_cost, debias=False, rho = [None, rho_y] ---
    a = 1.0 / N
    b = 1.0 / M
    loss_x = a * jnp.sum(f_new, axis=0, keepdims=True)                         # (1, 1)
    loss_y = (b * (rho_y + eps_target / 2.0)
              * jnp.sum(1.0 - jnp.exp(g_new * (-1.0 / rho_y)),
                        axis=1, keepdims=True))                                # (1, 1)
    out_ref[...] = loss_x + loss_y


@functools.partial(jax.jit, static_argnames=("blur", "reach", "scaling"))
def sus_loss(synth_feature_sample, yT, y2, y_min, y_max, *,
             blur=0.001, reach=1.0, scaling=0.9):
    p = 2
    x = jnp.asarray(synth_feature_sample, jnp.float32)
    N, D = x.shape
    Dy, M = yT.shape
    assert D == Dy, "feature dims must match"

    rho_y = float(reach) ** p            # reach = [None, reach]
    eps_target = float(blur) ** p

    # --- geomloss max_diameter(x, y), computed fully on device (no host sync) ---
    mins = jnp.minimum(jnp.min(x, axis=0), y_min)
    maxs = jnp.maximum(jnp.max(x, axis=0), y_max)
    diameter = jnp.sqrt(jnp.sum((maxs - mins) ** 2))
    # Guard degenerate identical clouds (geomloss would log(0)); only differs
    # from geomloss for diameter < blur, where the schedule is trivial anyway.
    diameter = jnp.maximum(diameter, jnp.float32(blur))

    # --- epsilon_schedule(p, diameter, blur, scaling), padded to MAX_STEPS ---
    log_d = p * jnp.log(diameter)                    # traced scalar
    log_b = p * math.log(blur)
    log_s = p * math.log(scaling)                    # negative
    n_mid = jnp.ceil((log_b - log_d) / log_s)
    n_mid = jnp.clip(n_mid, 0.0, float(MAX_STEPS - 2)).astype(jnp.int32)
    n_steps = (n_mid + 2).astype(jnp.int32)          # = len(eps_list)

    idx_i = jnp.arange(MAX_STEPS, dtype=jnp.int32)
    idx_f = idx_i.astype(jnp.float32)
    mid_vals = jnp.exp(log_d + (idx_f - 1.0) * log_s)
    eps_arr = jnp.where(idx_i == 0, jnp.exp(log_d),
                        jnp.where(idx_i <= n_mid, mid_vals,
                                  jnp.float32(eps_target))).astype(jnp.float32)

    # Per-step scalars precomputed (exact reciprocals; no in-loop scalar divides).
    inv_eps_arr = (1.0 / eps_arr).astype(jnp.float32)
    damp_arr = (1.0 / (1.0 + eps_arr / rho_y)).astype(jnp.float32)
    n_steps_arr = jnp.reshape(n_steps, (1,))

    kernel = functools.partial(_sus_sinkhorn_kernel,
                               rho_y=rho_y, eps_target=eps_target)

    # VMEM budget: C + exp/softmin temporaries (~4-6 x NxM f32) + operands.
    vmem_bytes = 4 * (6 * N * M + N * D + D * M + 8 * (N + M)) + (1 << 20)
    vmem_bytes = int(min(max(vmem_bytes, 4 << 20), 64 << 20))

    cost = pl.CostEstimate(
        flops=int(2 * N * D * M + (MAX_STEPS + 2) * 10 * N * M),
        transcendentals=int((MAX_STEPS + 2) * 2 * N * M),
        bytes_accessed=int(4 * (N * D + D * M + M + 3 * MAX_STEPS + 2)),
    )

    # TODO(synk): if many synth samples are scored per step, add a leading batch
    # grid axis with dimension_semantics=("parallel",) so v7x uses both TCs.
    out = pl.pallas_call(
        kernel,
        out_shape=jax.ShapeDtypeStruct((1, 1), jnp.float32),
        in_specs=[
            pl.BlockSpec(memory_space=pltpu.MemorySpace.SMEM),   # n_steps (int32 scalar)
            pl.BlockSpec(memory_space=pltpu.MemorySpace.SMEM),   # eps schedule
            pl.BlockSpec(memory_space=pltpu.MemorySpace.SMEM),   # 1 / eps
            pl.BlockSpec(memory_space=pltpu.MemorySpace.SMEM),   # damping_y per step
            pl.BlockSpec(memory_space=pltpu.MemorySpace.VMEM),   # x = synth points
            pl.BlockSpec(memory_space=pltpu.MemorySpace.VMEM),   # y.T (D, M)
            pl.BlockSpec(memory_space=pltpu.MemorySpace.VMEM),   # ||y||^2 (1, M)
        ],
        out_specs=pl.BlockSpec(memory_space=pltpu.MemorySpace.VMEM),
        compiler_params=pltpu.CompilerParams(vmem_limit_bytes=vmem_bytes),
        cost_estimate=cost,
    )(n_steps_arr, eps_arr, inv_eps_arr, damp_arr, x, yT, y2)
    return out[0, 0]


class SuSLoss:
    """JAX/Pallas counterpart of the PyTorch SuSLoss module."""

    def __init__(self, input_feature_sample, blur=0.001, reach=1, scaling=0.9, **kwargs):
        self.blur = float(blur)
        self.reach = float(reach)
        self.scaling = float(scaling)
        self.p = 2
        y = jnp.asarray(input_feature_sample, jnp.float32)          # (M, D)
        # Call-invariant precomputation: transposed points (lane axis = M),
        # squared norms, and per-feature min/max for the diameter.
        self.yT = jnp.transpose(y)                                   # (D, M)
        self.y2 = jnp.sum(y * y, axis=1, keepdims=True).T            # (1, M)
        self.y_min = jnp.min(y, axis=0)                              # (D,)
        self.y_max = jnp.max(y, axis=0)                              # (D,)

    def __call__(self, synth_feature_sample):
        return sus_loss(synth_feature_sample, self.yT, self.y2,
                        self.y_min, self.y_max,
                        blur=self.blur, reach=self.reach, scaling=self.scaling)


if __name__ == "__main__":
    key = jax.random.PRNGKey(0)
    k_in, k_syn = jax.random.split(key)

    N, M, D = 64, 128, 32                       # synth points, stored points, feature dim
    input_feature_sample = jax.random.normal(k_in, (M, D), dtype=jnp.float32)
    synth_feature_sample = jax.random.normal(k_syn, (N, D), dtype=jnp.float32)

    loss_module = SuSLoss(input_feature_sample, blur=0.001, reach=1, scaling=0.9)
    loss = loss_module(synth_feature_sample)
    jax.block_until_ready(loss)
    print("KERNEL_OK")
</pallas_src>

<mosaic_0001>
module attributes {stable_mosaic.version = 11 : i64} {
  func.func @_sus_sinkhorn_kernel(%arg0: memref<1xi32, #tpu.memory_space<smem>>, %arg1: memref<256xf32, #tpu.memory_space<smem>>, %arg2: memref<256xf32, #tpu.memory_space<smem>>, %arg3: memref<256xf32, #tpu.memory_space<smem>>, %arg4: memref<64x32xf32, #tpu.memory_space<vmem>>, %arg5: memref<32x128xf32, #tpu.memory_space<vmem>>, %arg6: memref<1x128xf32, #tpu.memory_space<vmem>>, %arg7: memref<1x1xf32, #tpu.memory_space<vmem>>) attributes {dimension_semantics = [], scalar_prefetch = 0 : i64, scratch_operands = 0 : i64, tpu.core_type = #tpu.core_type<tc>} {
    %c0 = arith.constant 0 : index
    %c0_0 = arith.constant 0 : index
    %0 = vector.load %arg4[%c0, %c0_0] : memref<64x32xf32, #tpu.memory_space<vmem>>, vector<64x32xf32>
    %c0_1 = arith.constant 0 : index
    %c0_2 = arith.constant 0 : index
    %1 = vector.load %arg5[%c0_1, %c0_2] : memref<32x128xf32, #tpu.memory_space<vmem>>, vector<32x128xf32>
    %c0_3 = arith.constant 0 : index
    %c0_4 = arith.constant 0 : index
    %2 = vector.load %arg6[%c0_3, %c0_4] : memref<1x128xf32, #tpu.memory_space<vmem>>, vector<1x128xf32>
    %3 = arith.mulf %0, %0 : vector<64x32xf32>
    %cst = arith.constant dense<0.000000e+00> : vector<64xf32>
    %4 = vector.multi_reduction <add>, %3, %cst [1] : vector<64x32xf32> to vector<64xf32>
    %5 = vector.shape_cast %4 : vector<64xf32> to vector<64x1xf32>
    %cst_5 = arith.constant dense<0.000000e+00> : vector<64x128xf32>
    %6 = tpu.matmul %0, %1, %cst_5 {dimension_numbers = #tpu.dot_dimension_numbers<[1], [0], [0], [1], [0, 0, 1, 1], [], []>} : vector<64x32xf32>, vector<32x128xf32>, vector<64x128xf32> -> vector<64x128xf32>
    %cst_6 = arith.constant 2.000000e+00 : f32
    %7 = vector.broadcast %cst_6 : f32 to vector<64x128xf32>
    %8 = arith.mulf %7, %6 : vector<64x128xf32>
    %9 = vector.broadcast %5 : vector<64x1xf32> to vector<64x128xf32>
    %10 = arith.subf %9, %8 : vector<64x128xf32>
    %11 = vector.broadcast %2 : vector<1x128xf32> to vector<64x128xf32>
    %12 = arith.addf %10, %11 : vector<64x128xf32>
    %cst_7 = arith.constant 5.000000e-01 : f32
    %13 = vector.broadcast %cst_7 : f32 to vector<64x128xf32>
    %14 = arith.mulf %13, %12 : vector<64x128xf32>
    %c0_8 = arith.constant 0 : index
    %15 = memref.load %arg1[%c0_8] : memref<256xf32, #tpu.memory_space<smem>>
    %c0_9 = arith.constant 0 : index
    %16 = memref.load %arg2[%c0_9] : memref<256xf32, #tpu.memory_space<smem>>
    %c0_10 = arith.constant 0 : index
    %17 = memref.load %arg3[%c0_10] : memref<256xf32, #tpu.memory_space<smem>>
    %cst_11 = arith.constant 0.000000e+00 : f32
    %18 = arith.subf %cst_11, %16 : f32
    %19 = vector.broadcast %18 : f32 to vector<64x128xf32>
    %20 = arith.mulf %14, %19 : vector<64x128xf32>
    %cst_12 = arith.constant 0.000000e+00 : f32
    %21 = arith.subf %cst_12, %15 : f32
    %cst_13 = arith.constant -4.85203028 : f32
    %22 = vector.broadcast %cst_13 : f32 to vector<64x128xf32>
    %23 = arith.addf %22, %20 : vector<64x128xf32>
    %cst_14 = arith.constant dense<0xFF800000> : vector<64xf32>
    %24 = vector.multi_reduction <maximumf>, %23, %cst_14 [1] : vector<64x128xf32> to vector<64xf32>
    %25 = vector.shape_cast %24 : vector<64xf32> to vector<64x1xf32>
    %26 = vector.broadcast %25 : vector<64x1xf32> to vector<64x128xf32>
    %27 = arith.subf %23, %26 : vector<64x128xf32>
    %28 = math.exp %27 : vector<64x128xf32>
    %cst_15 = arith.constant dense<0.000000e+00> : vector<64xf32>
    %29 = vector.multi_reduction <add>, %28, %cst_15 [1] : vector<64x128xf32> to vector<64xf32>
    %30 = vector.shape_cast %29 : vector<64xf32> to vector<64x1xf32>
    %31 = math.log %30 : vector<64x1xf32>
    %32 = arith.addf %25, %31 : vector<64x1xf32>
    %33 = vector.broadcast %21 : f32 to vector<64x1xf32>
    %34 = arith.mulf %33, %32 : vector<64x1xf32>
    %cst_16 = arith.constant 0.000000e+00 : f32
    %35 = arith.subf %cst_16, %15 : f32
    %cst_17 = arith.constant -4.15888309 : f32
    %36 = vector.broadcast %cst_17 : f32 to vector<64x128xf32>
    %37 = arith.addf %36, %20 : vector<64x128xf32>
    %cst_18 = arith.constant dense<0xFF800000> : vector<128xf32>
    %38 = vector.multi_reduction <maximumf>, %37, %cst_18 [0] : vector<64x128xf32> to vector<128xf32>
    %39 = vector.shape_cast %38 : vector<128xf32> to vector<1x128xf32>
    %40 = vector.broadcast %39 : vector<1x128xf32> to vector<64x128xf32>
    %41 = arith.subf %37, %40 : vector<64x128xf32>
    %42 = math.exp %41 : vector<64x128xf32>
    %cst_19 = arith.constant dense<0.000000e+00> : vector<128xf32>
    %43 = vector.multi_reduction <add>, %42, %cst_19 [0] : vector<64x128xf32> to vector<128xf32>
    %44 = vector.shape_cast %43 : vector<128xf32> to vector<1x128xf32>
    %45 = math.log %44 : vector<1x128xf32>
    %46 = arith.addf %39, %45 : vector<1x128xf32>
    %47 = vector.broadcast %35 : f32 to vector<1x128xf32>
    %48 = arith.mulf %47, %46 : vector<1x128xf32>
    %49 = vector.broadcast %17 : f32 to vector<1x128xf32>
    %50 = arith.mulf %49, %48 : vector<1x128xf32>
    %c0_20 = arith.constant 0 : index
    %51 = memref.load %arg0[%c0_20] : memref<1xi32, #tpu.memory_space<smem>>
    %c0_i32 = arith.constant 0 : i32
    %52 = arith.subi %51, %c0_i32 : i32
    %53 = arith.addi %c0_i32, %52 : i32
    %c1_i32 = arith.constant 1 : i32
    %54:2 = scf.for %arg8 = %c0_i32 to %53 step %c1_i32 iter_args(%arg9 = %34, %arg10 = %50) -> (vector<64x1xf32>, vector<1x128xf32>)  : i32 {
      %108 = arith.index_cast %arg8 : i32 to index
      %109 = memref.load %arg1[%108] : memref<256xf32, #tpu.memory_space<smem>>
      %110 = arith.index_cast %arg8 : i32 to index
      %111 = memref.load %arg2[%110] : memref<256xf32, #tpu.memory_space<smem>>
      %112 = arith.index_cast %arg8 : i32 to index
      %113 = memref.load %arg3[%112] : memref<256xf32, #tpu.memory_space<smem>>
      %cst_41 = arith.constant 0.000000e+00 : f32
      %114 = arith.subf %cst_41, %111 : f32
      %115 = vector.broadcast %114 : f32 to vector<64x128xf32>
      %116 = arith.mulf %14, %115 : vector<64x128xf32>
      %cst_42 = arith.constant 0.000000e+00 : f32
      %117 = arith.subf %cst_42, %109 : f32
      %118 = vector.broadcast %111 : f32 to vector<1x128xf32>
      %119 = arith.mulf %arg10, %118 : vector<1x128xf32>
      %cst_43 = arith.constant -4.85203028 : f32
      %120 = vector.broadcast %cst_43 : f32 to vector<1x128xf32>
      %121 = arith.addf %120, %119 : vector<1x128xf32>
      %122 = vector.broadcast %121 : vector<1x128xf32> to vector<64x128xf32>
      %123 = arith.addf %122, %116 : vector<64x128xf32>
      %cst_44 = arith.constant dense<0xFF800000> : vector<64xf32>
      %124 = vector.multi_reduction <maximumf>, %123, %cst_44 [1] : vector<64x128xf32> to vector<64xf32>
      %125 = vector.shape_cast %124 : vector<64xf32> to vector<64x1xf32>
      %126 = vector.broadcast %125 : vector<64x1xf32> to vector<64x128xf32>
      %127 = arith.subf %123, %126 : vector<64x128xf32>
      %128 = math.exp %127 : vector<64x128xf32>
      %cst_45 = arith.constant dense<0.000000e+00> : vector<64xf32>
      %129 = vector.multi_reduction <add>, %128, %cst_45 [1] : vector<64x128xf32> to vector<64xf32>
      %130 = vector.shape_cast %129 : vector<64xf32> to vector<64x1xf32>
      %131 = math.log %130 : vector<64x1xf32>
      %132 = arith.addf %125, %131 : vector<64x1xf32>
      %133 = vector.broadcast %117 : f32 to vector<64x1xf32>
      %134 = arith.mulf %133, %132 : vector<64x1xf32>
      %cst_46 = arith.constant 0.000000e+00 : f32
      %135 = arith.subf %cst_46, %109 : f32
      %136 = vector.broadcast %111 : f32 to vector<64x1xf32>
      %137 = arith.mulf %arg9, %136 : vector<64x1xf32>
      %cst_47 = arith.constant -4.15888309 : f32
      %138 = vector.broadcast %cst_47 : f32 to vector<64x1xf32>
      %139 = arith.addf %138, %137 : vector<64x1xf32>
      %140 = vector.broadcast %139 : vector<64x1xf32> to vector<64x128xf32>
      %141 = arith.addf %140, %116 : vector<64x128xf32>
      %cst_48 = arith.constant dense<0xFF800000> : vector<128xf32>
      %142 = vector.multi_reduction <maximumf>, %141, %cst_48 [0] : vector<64x128xf32> to vector<128xf32>
      %143 = vector.shape_cast %142 : vector<128xf32> to vector<1x128xf32>
      %144 = vector.broadcast %143 : vector<1x128xf32> to vector<64x128xf32>
      %145 = arith.subf %141, %144 : vector<64x128xf32>
      %146 = math.exp %145 : vector<64x128xf32>
      %cst_49 = arith.constant dense<0.000000e+00> : vector<128xf32>
      %147 = vector.multi_reduction <add>, %146, %cst_49 [0] : vector<64x128xf32> to vector<128xf32>
      %148 = vector.shape_cast %147 : vector<128xf32> to vector<1x128xf32>
      %149 = math.log %148 : vector<1x128xf32>
      %150 = arith.addf %143, %149 : vector<1x128xf32>
      %151 = vector.broadcast %135 : f32 to vector<1x128xf32>
      %152 = arith.mulf %151, %150 : vector<1x128xf32>
      %153 = vector.broadcast %113 : f32 to vector<1x128xf32>
      %154 = arith.mulf %153, %152 : vector<1x128xf32>
      %155 = arith.addf %arg9, %134 : vector<64x1xf32>
      %cst_50 = arith.constant 5.000000e-01 : f32
      %156 = vector.broadcast %cst_50 : f32 to vector<64x1xf32>
      %157 = arith.mulf %156, %155 : vector<64x1xf32>
      %158 = arith.addf %arg10, %154 : vector<1x128xf32>
      %cst_51 = arith.constant 5.000000e-01 : f32
      %159 = vector.broadcast %cst_51 : f32 to vector<1x128xf32>
      %160 = arith.mulf %159, %158 : vector<1x128xf32>
      scf.yield %157, %160 : vector<64x1xf32>, vector<1x128xf32>
    }
    %cst_21 = arith.constant -1.000000e+06 : f32
    %55 = vector.broadcast %cst_21 : f32 to vector<64x128xf32>
    %56 = arith.mulf %14, %55 : vector<64x128xf32>
    %cst_22 = arith.constant 1.000000e+06 : f32
    %57 = vector.broadcast %cst_22 : f32 to vector<1x128xf32>
    %58 = arith.mulf %54#1, %57 : vector<1x128xf32>
    %cst_23 = arith.constant -4.85203028 : f32
    %59 = vector.broadcast %cst_23 : f32 to vector<1x128xf32>
    %60 = arith.addf %59, %58 : vector<1x128xf32>
    %61 = vector.broadcast %60 : vector<1x128xf32> to vector<64x128xf32>
    %62 = arith.addf %61, %56 : vector<64x128xf32>
    %cst_24 = arith.constant dense<0xFF800000> : vector<64xf32>
    %63 = vector.multi_reduction <maximumf>, %62, %cst_24 [1] : vector<64x128xf32> to vector<64xf32>
    %64 = vector.shape_cast %63 : vector<64xf32> to vector<64x1xf32>
    %65 = vector.broadcast %64 : vector<64x1xf32> to vector<64x128xf32>
    %66 = arith.subf %62, %65 : vector<64x128xf32>
    %67 = math.exp %66 : vector<64x128xf32>
    %cst_25 = arith.constant dense<0.000000e+00> : vector<64xf32>
    %68 = vector.multi_reduction <add>, %67, %cst_25 [1] : vector<64x128xf32> to vector<64xf32>
    %69 = vector.shape_cast %68 : vector<64xf32> to vector<64x1xf32>
    %70 = math.log %69 : vector<64x1xf32>
    %71 = arith.addf %64, %70 : vector<64x1xf32>
    %cst_26 = arith.constant -9.99999997E-7 : f32
    %72 = vector.broadcast %cst_26 : f32 to vector<64x1xf32>
    %73 = arith.mulf %72, %71 : vector<64x1xf32>
    %cst_27 = arith.constant 1.000000e+06 : f32
    %74 = vector.broadcast %cst_27 : f32 to vector<64x1xf32>
    %75 = arith.mulf %54#0, %74 : vector<64x1xf32>
    %cst_28 = arith.constant -4.15888309 : f32
    %76 = vector.broadcast %cst_28 : f32 to vector<64x1xf32>
    %77 = arith.addf %76, %75 : vector<64x1xf32>
    %78 = vector.broadcast %77 : vector<64x1xf32> to vector<64x128xf32>
    %79 = arith.addf %78, %56 : vector<64x128xf32>
    %cst_29 = arith.constant dense<0xFF800000> : vector<128xf32>
    %80 = vector.multi_reduction <maximumf>, %79, %cst_29 [0] : vector<64x128xf32> to vector<128xf32>
    %81 = vector.shape_cast %80 : vector<128xf32> to vector<1x128xf32>
    %82 = vector.broadcast %81 : vector<1x128xf32> to vector<64x128xf32>
    %83 = arith.subf %79, %82 : vector<64x128xf32>
    %84 = math.exp %83 : vector<64x128xf32>
    %cst_30 = arith.constant dense<0.000000e+00> : vector<128xf32>
    %85 = vector.multi_reduction <add>, %84, %cst_30 [0] : vector<64x128xf32> to vector<128xf32>
    %86 = vector.shape_cast %85 : vector<128xf32> to vector<1x128xf32>
    %87 = math.log %86 : vector<1x128xf32>
    %88 = arith.addf %81, %87 : vector<1x128xf32>
    %cst_31 = arith.constant -9.99999997E-7 : f32
    %89 = vector.broadcast %cst_31 : f32 to vector<1x128xf32>
    %90 = arith.mulf %89, %88 : vector<1x128xf32>
    %cst_32 = arith.constant 0.999998986 : f32
    %91 = vector.broadcast %cst_32 : f32 to vector<1x128xf32>
    %92 = arith.mulf %91, %90 : vector<1x128xf32>
    %cst_33 = arith.constant dense<0.000000e+00> : vector<1xf32>
    %93 = vector.multi_reduction <add>, %73, %cst_33 [0] : vector<64x1xf32> to vector<1xf32>
    %94 = vector.shape_cast %93 : vector<1xf32> to vector<1x1xf32>
    %cst_34 = arith.constant 1.562500e-02 : f32
    %95 = vector.broadcast %cst_34 : f32 to vector<1x1xf32>
    %96 = arith.mulf %95, %94 : vector<1x1xf32>
    %cst_35 = arith.constant -1.000000e+00 : f32
    %97 = vector.broadcast %cst_35 : f32 to vector<1x128xf32>
    %98 = arith.mulf %92, %97 : vector<1x128xf32>
    %99 = math.exp %98 : vector<1x128xf32>
    %cst_36 = arith.constant 1.000000e+00 : f32
    %100 = vector.broadcast %cst_36 : f32 to vector<1x128xf32>
    %101 = arith.subf %100, %99 : vector<1x128xf32>
    %cst_37 = arith.constant dense<0.000000e+00> : vector<1xf32>
    %102 = vector.multi_reduction <add>, %101, %cst_37 [1] : vector<1x128xf32> to vector<1xf32>
    %103 = vector.shape_cast %102 : vector<1xf32> to vector<1x1xf32>
    %cst_38 = arith.constant 0.00781250372 : f32
    %104 = vector.broadcast %cst_38 : f32 to vector<1x1xf32>
    %105 = arith.mulf %104, %103 : vector<1x1xf32>
    %106 = arith.addf %96, %105 : vector<1x1xf32>
    %c0_39 = arith.constant 0 : index
    %c0_40 = arith.constant 0 : index
    %107 = vector.load %arg7[%c0_39, %c0_40] : memref<1x1xf32, #tpu.memory_space<vmem>>, vector<1x1xf32>
    tpu.vector_store %arg7[%c0_39, %c0_40], %106 {strides = array<i32>} : memref<1x1xf32, #tpu.memory_space<vmem>>, vector<1x1xf32>,
    return
  }
}

</mosaic_0001>

<bundles_post_ra>
// kernel: sus_loss.1
= control target key start
LH: loop header
LB: loop body
LE: loop exit
PB: predicated region body
PF: predicated region fallthrough
CT: control target
= control target key end

     0   :  { %13 = vsyncpa [#allocation5], 0  ;;  %s2025_s0 = inlined_call_operand.<no memory space> [shape: s32[1], index: 0, kind: input, shape index: {}]   ;;  %s2026_s1 = inlined_call_operand.vmem [shape: f32[256], index: 1, kind: input, shape index: {}]   ;;  %s2027_s2 = inlined_call_operand.vmem [shape: f32[256], index: 2, kind: input, shape index: {}]   ;;  %s2028_s3 = inlined_call_operand.vmem [shape: f32[256], index: 3, kind: input, shape index: {}]   ;;  %s2029_s4 = inlined_call_operand.vmem [shape: f32[64,32], index: 4, kind: input, shape index: {}]   ;;  %s2030_s5 = inlined_call_operand.vmem [shape: f32[32,128], index: 5, kind: input, shape index: {}]   ;;  %s2031_s6 = inlined_call_operand.vmem [shape: f32[1,128], index: 6, kind: input, shape index: {}]   ;;  %s2032_s7 = inlined_call_operand.hbm [shape: f32[1,1], index: 7, kind: output, shape index: {}]  }
   0x1   :  { %14 = vsyncpa [#allocation7], 0  ;;  %s34_s26 = sshll.u32 %s2027_s2, 4  ;;  %s35_s26 = int_to_ptr.vmem [resolvable:$true] %s34_s26 }
   0x2   :  { %15 = vsyncpa [#allocation4], 0  ;;  %s24_s29 = sshll.u32 %s2026_s1, 4  ;;  %s1295_s30 = scalar_lea.vmem %s35_s26, 32  ;;  %s25_s29 = int_to_ptr.vmem [resolvable:$true] %s24_s29 }
   0x3   :  { %p1296_p0 = scmp.ne.s32.totalorder %s35_s26, %s1295_s30  ;;  %p1300_p1 = scmp.lt.s32.totalorder %s35_s26, %s35_s26 }
   0x4   :  { %p1301_p2 = scmp.lt.s32.totalorder %s1295_s30, %s1295_s30 }
   0x6   :  { %p1302_p3 = por %p1301_p2, %p1300_p1 }
   0x8   :  { %p1303_p4 = pnand %p1302_p3, %p1296_p0 }
   0xa   :  { %1306 = shalt.err (!%p1303_p4)
}
   0xb   :  { %s1509_s8 = smov [#allocation6]   ;;  %s1307_s9 = scalar_lea.vmem %s25_s29, 32 }
   0xc   :  { %37 = dma.vmem_to_smem %s35_s26, 32, %s1509_s8, [#allocation7]  }
   0xd   :  { %p1308_p5 = scmp.ne.s32.totalorder %s25_s29, %s1307_s9  ;;  %p1312_p6 = scmp.lt.s32.totalorder %s25_s29, %s25_s29 }
   0xe   :  { %p1313_p7 = scmp.lt.s32.totalorder %s1307_s9, %s1307_s9 }
  0x10   :  { %p1314_p8 = por %p1313_p7, %p1312_p6 }
  0x12   :  { %p1315_p9 = pnand %p1314_p8, %p1308_p5 }
  0x14   :  { %1318 = shalt.err (!%p1315_p9)
}
  0x15   :  { %s1510_s2 = smov [#allocation3]   ;;  %s44_s11 = sshll.u32 %s2028_s3, 4  ;;  %s45_s11 = int_to_ptr.vmem [resolvable:$true] %s44_s11 }
  0x16   :  { %27 = dma.vmem_to_smem %s25_s29, 32, %s1510_s2, [#allocation5]  }
  0x17   :  { %s1319_s12 = scalar_lea.vmem %s45_s11, 32  ;;  %p1324_p11 = scmp.lt.s32.totalorder %s45_s11, %s45_s11 }
  0x18   :  { %p1320_p10 = scmp.ne.s32.totalorder %s45_s11, %s1319_s12  ;;  %p1325_p12 = scmp.lt.s32.totalorder %s1319_s12, %s1319_s12 }
  0x1a   :  { %p1326_p13 = por %p1325_p12, %p1324_p11 }
  0x1c   :  { %p1327_p0 = pnand %p1326_p13, %p1320_p10 }
  0x1e   :  { %1330 = shalt.err (!%p1327_p0)
}
  0x1f   :  { %s1511_s13 = smov [#allocation8]  }
  0x20   :  { %47 = dma.vmem_to_smem %s45_s11, 32, %s1511_s13, [#allocation7]  }
  0x21   :  { %1427 = dma.done.wait [#allocation5], 32  }
  0x22   :  { %1428 = vsyncadd [#allocation5], 4294967264 }
  0x23   :  { %1429 = dma.done.wait [#allocation7], 64  }
  0x24   :  { %1430 = vsyncadd [#allocation7], 4294967232 }
  0x25   :  { %63 = sfence }
  0x26   :  { %v75_v0 = vld [vmem:[%s2030_s5 + $0x18] sm:$0xff]  ;;  %v74_v1 = vld [vmem:[%s2030_s5 + $0x10] sm:$0xff]  ;;  %v73_v2 = vld [vmem:[%s2030_s5 + $0x8] sm:$0xff]  ;;  %vm85_vm0 = vcmask 261120   ;;  %s279_s14 = sld [smem:[#allocation8]]  ;;  %p946_p1 = scmp.le.s32.totalorder %s2025_s0, 0 }
  0x27   :  { %959 = vmatprep.subr.mxu0 %v75_v0  ;;  %979 = vmatprep.subr.mxu1 %v75_v0  ;;  %v72_v3 = vld [vmem:[%s2030_s5] sm:$0xff]  ;;  %v66_v5 = vld [vmem:[%s2029_s4 + $0x10] sm:$0xff]  ;;  %v65_v9 = vld [vmem:[%s2029_s4 + $0x8] sm:$0xff]  ;;  %s1759_s17 = smov (!%p946_p1), 0  }
  0x28   :  { %960 = vmatpush3.msra.mxu0 %v75_v0  ;;  %983 = vmatpush3.msra.mxu1 %v75_v0  ;;  %v64_v4 = vld [vmem:[%s2029_s4] sm:$0xff]  ;;  %v79_v7 = vmul.f32 %v66_v5, %v66_v5  ;;  %v69_v10 = vld [vmem:[%s2029_s4 + $0x28] sm:$0xff]  ;;  %v70_v11 = vld [vmem:[%s2029_s4 + $0x30] sm:$0xff]  ;;  %v78_v16 = vmul.f32 %v65_v9, %v65_v9 }
  0x29   :  { %961 = vmatprep.subr.mxu0 %v74_v1  ;;  %980 = vmatprep.subr.mxu1 %v74_v1  ;;  %v77_v6 = vmul.f32 %v64_v4, %v64_v4  ;;  %v68_v8 = vld [vmem:[%s2029_s4 + $0x20] sm:$0xff]  ;;  %v67_v12 = vld [vmem:[%s2029_s4 + $0x18] sm:$0xff]  ;;  %v82_v21 = vmul.f32 %v69_v10, %v69_v10  ;;  %v83_v25 = vmul.f32 %v70_v11, %v70_v11 }
  0x2a   :  { %962 = vmatpush3.msra.mxu0 %v74_v1  ;;  %984 = vmatpush3.msra.mxu1 %v74_v1  ;;  %v92_v13 = vsel %vm85_vm0, %v79_v7, 0.0  ;;  %v80_v15 = vmul.f32 %v67_v12, %v67_v12  ;;  %v71_v17 = vld [vmem:[%s2029_s4 + $0x38] sm:$0xff]  ;;  %v81_v18 = vmul.f32 %v68_v8, %v68_v8  ;;  %v89_v20 = vsel %vm85_vm0, %v78_v16, 0.0  ;;  %s278_s4 = sld [smem:[#allocation6]]  ;;  %v945_v38 = vld [vmem:[%s2031_s6] ss:$0 sm:$0xff] }
  0x2b   :  { %963 = vmatprep.subr.mxu0 %v73_v2  ;;  %981 = vmatprep.subr.mxu1 %v73_v2  ;;  %v86_v14 = vsel %vm85_vm0, %v77_v6, 0.0  ;;  %v101_v22 = vsel %vm85_vm0, %v82_v21, 0.0  ;;  %v84_v24 = vmul.f32 %v71_v17, %v71_v17  ;;  %v104_v27 = vsel %vm85_vm0, %v83_v25, 0.0  ;;  %s277_s6 = sld [smem:[#allocation3]] }
  0x2c   :  { %964 = vmatpush3.msra.mxu0 %v73_v2  ;;  %985 = vmatpush3.msra.mxu1 %v73_v2  ;;  %v95_v19 = vsel %vm85_vm0, %v80_v15, 0.0  ;;  %v98_v23 = vsel %vm85_vm0, %v81_v18, 0.0 }
  0x2d   :  { %965 = vmatprep.subr.mxu0 %v72_v3  ;;  %982 = vmatprep.subr.mxu1 %v72_v3  ;;  %v107_v26 = vsel %vm85_vm0, %v84_v24, 0.0 }
  0x2e   :  { %966 = vmatpush3.msra.mxu0 %v72_v3  ;;  %986 = vmatpush3.msra.mxu1 %v72_v3 }
  0x2f   :  { %967 = vmatprep.mubr.msk.f32.mxu0 %vm85_vm0, %v64_v4  ;;  %973 = vmatprep.mubr.msk.f32.mxu1 %vm85_vm0, %v68_v8 }
  0x30   :  { %968 = vmatmul.mubr.msk.f32.vlgmr.msra.gmra.mxu0 %vm85_vm0, %v65_v9  ;;  %974 = vmatmul.mubr.msk.f32.vlgmr.msra.gmra.mxu1 %vm85_vm0, %v69_v10  ;;  %s280_s13 = ssub.f32 0.0, %s278_s4 }
  0x31   :  { %970 = vmatprep.mubr.msk.f32.mxu0 %vm85_vm0, %v66_v5  ;;  %976 = vmatprep.mubr.msk.f32.mxu1 %vm85_vm0, %v70_v11  ;;  %s290_s15 = ssub.f32 0.0, %s277_s6 }
  0x32   :  { %93 = vadd.xlane.f32.xlu1 %v92_v13  ;;  %87 = vadd.xlane.f32.xlu0 %v86_v14  ;;  %v281_v56 = vstv %s280_s13 }
  0x34   :  { %971 = vmatmul.mubr.msk.f32.gmra.mxu0 %vm85_vm0, %v67_v12  ;;  %977 = vmatmul.mubr.msk.f32.gmra.mxu1 %vm85_vm0, %v71_v17 }
  0x36   :  { %96 = vadd.xlane.f32.xlu1 %v95_v19  ;;  %90 = vadd.xlane.f32.xlu0 %v89_v20 }
  0x3a   :  { %102 = vadd.xlane.f32.xlu1 %v101_v22  ;;  %99 = vadd.xlane.f32.xlu0 %v98_v23 }
  0x3e   :  { %108 = vadd.xlane.f32.xlu1 %v107_v26  ;;  %105 = vadd.xlane.f32.xlu0 %v104_v27 }
  0xbb   :  { %v94_v28 = vpop.xlane.xlu1 %93  ;;  %v88_v29 = vpop.xlane.xlu0 %87 }
  0xbf   :  { %v97_v30 = vpop.xlane.xlu1 %96  ;;  %v91_v31 = vpop.xlane.xlu0 %90 }
  0xc3   :  { %v103_v32 = vpop.xlane.xlu1 %102  ;;  %v100_v37 = vpop.xlane.xlu0 %99 }
  0xc7   :  { %v109_v51 = vpop.xlane.xlu1 %108  ;;  %v106_v61 = vpop.xlane.xlu0 %105 }
  0xf0   :  { %v969_v33 = vpop.f32.mrf.mxu0  ;;  %v975_v34 = vpop.f32.mrf.mxu1 }
  0xf1   :  { %v240_v35 = vmul.f32 2.0, %v969_v33  ;;  %v244_v36 = vmul.f32 2.0, %v975_v34 }
  0xf2   :  { %v220_v39 = vpop.f32.mrf.mxu1  ;;  %v200_v40 = vpop.f32.mrf.mxu0 }
  0xf3   :  { %v248_v41 = vsub.f32 %v91_v31, %v240_v35  ;;  %v243_v42 = vmul.f32 2.0, %v220_v39  ;;  %v252_v43 = vsub.f32 %v103_v32, %v244_v36  ;;  %v239_v44 = vmul.f32 2.0, %v200_v40 }
  0xf4   :  { %v972_v45 = vpop.f32.mrf.mxu0  ;;  %v978_v46 = vpop.f32.mrf.mxu1 }
  0xf5   :  { %v262_v47 = vadd.f32 %v945_v38, %v248_v41  ;;  %v266_v48 = vadd.f32 %v945_v38, %v252_v43  ;;  %v247_v49 = vsub.f32 %v88_v29, %v239_v44  ;;  %v242_v50 = vmul.f32 2.0, %v972_v45 }
  0xf6   :  { %v246_v52 = vmul.f32 2.0, %v978_v46  ;;  %v251_v53 = vsub.f32 %v100_v37, %v243_v42  ;;  %v230_v54 = vpop.f32.mrf.mxu1  ;;  %v210_v55 = vpop.f32.mrf.mxu0 }
  0xf7   :  { %v1617_v57 = vmul.f32 0.5, %v262_v47  ;;  %v1619_v58 = vmul.f32 0.5, %v266_v48  ;;  %v261_v59 = vadd.f32 %v945_v38, %v247_v49  ;;  %v250_v60 = vsub.f32 %v97_v30, %v242_v50 }
  0xf8   :  { %v265_v62 = vadd.f32 %v945_v38, %v251_v53  ;;  %v245_v63 = vmul.f32 2.0, %v230_v54  ;;  %v254_v0 = vsub.f32 %v109_v51, %v246_v52  ;;  %v241_v1 = vmul.f32 2.0, %v210_v55 }
  0xf9   :  { %v1621_v2 = vmul.f32 0.5, %v261_v59  ;;  %v264_v3 = vadd.f32 %v945_v38, %v250_v60  ;;  %v283_v4 = vmul.f32 %v281_v56, %v1617_v57  ;;  %v287_v5 = vmul.f32 %v281_v56, %v1619_v58 }
  0xfa   :  { %v1625_v6 = vmul.f32 0.5, %v265_v62  ;;  %v268_v7 = vadd.f32 %v945_v38, %v254_v0  ;;  %v249_v8 = vsub.f32 %v94_v28, %v241_v1  ;;  %v253_v9 = vsub.f32 %v106_v61, %v245_v63 }
  0xfb   :  { %v1627_v10 = vmul.f32 0.5, %v264_v3  ;;  %v1629_v11 = vadd.f32 -4.8520303, %v283_v4  ;;  %v389_v12 = vadd.f32 -4.158883, %v283_v4  ;;  %v282_v13 = vmul.f32 %v281_v56, %v1621_v2 }
  0xfc   :  { %v1632_v14 = vmul.f32 0.5, %v268_v7  ;;  %v263_v15 = vadd.f32 %v945_v38, %v249_v8  ;;  %v267_v16 = vadd.f32 %v945_v38, %v253_v9  ;;  %v1634_v17 = vadd.f32 -4.8520303, %v287_v5 }
  0xfd   :  { %301 = vmax.xlane.f32.xlu1 %v1629_v11  ;;  %v1637_v18 = vadd.f32 -4.8520303, %v282_v13  ;;  %v388_v19 = vadd.f32 -4.158883, %v282_v13  ;;  %v393_v20 = vadd.f32 -4.158883, %v287_v5  ;;  %v286_v21 = vmul.f32 %v281_v56, %v1625_v6 }
  0xfe   :  { %v1640_v22 = vmul.f32 0.5, %v263_v15  ;;  %v1642_v23 = vmul.f32 0.5, %v267_v16  ;;  %v285_v24 = vmul.f32 %v281_v56, %v1627_v10  ;;  %v289_v25 = vmul.f32 %v281_v56, %v1632_v14 }
  0xff   :  { %299 = vmax.xlane.f32.xlu0 %v1637_v18  ;;  %v397_v26 = vmax.f32 %v389_v12, %v393_v20  ;;  %v392_v27 = vadd.f32 -4.158883, %v286_v21  ;;  %v1649_v30 = vadd.f32 -4.8520303, %v286_v21 }
 0x100   :  { %v391_v28 = vadd.f32 -4.158883, %v285_v24  ;;  %v284_v29 = vmul.f32 %v281_v56, %v1640_v22  ;;  %v395_v32 = vadd.f32 -4.158883, %v289_v25  ;;  %v288_v33 = vmul.f32 %v281_v56, %v1642_v23 }
 0x101   :  { %309 = vmax.xlane.f32.xlu1 %v1634_v17  ;;  %v396_v31 = vmax.f32 %v388_v19, %v392_v27  ;;  %v1653_v36 = vadd.f32 -4.8520303, %v285_v24  ;;  %v1658_v40 = vadd.f32 -4.8520303, %v289_v25 }
 0x102   :  { %v390_v34 = vadd.f32 -4.158883, %v284_v29  ;;  %v399_v37 = vmax.f32 %v391_v28, %v395_v32  ;;  %v394_v38 = vadd.f32 -4.158883, %v288_v33  ;;  %v1656_v39 = vadd.f32 -4.8520303, %v284_v29 }
 0x103   :  { %v400_v35 = vmax.f32 %v396_v31, %v397_v26  ;;  %307 = vmax.xlane.f32.xlu0 %v1649_v30  ;;  %v1662_v43 = vadd.f32 -4.8520303, %v288_v33 }
 0x104   :  { %v398_v41 = vmax.f32 %v390_v34, %v394_v38 }
 0x105   :  { %305 = vmax.xlane.f32.xlu1 %v1653_v36 }
 0x106   :  { %v401_v42 = vmax.f32 %v398_v41, %v399_v37  ;;  %v1665_v41 = vstv %s290_s15 }
 0x107   :  { %303 = vmax.xlane.f32.xlu0 %v1656_v39 }
 0x108   :  { %v402_v44 = vmax.f32 %v400_v35, %v401_v42 }
 0x109   :  { %313 = vmax.xlane.f32.xlu1 %v1658_v40 }
 0x10a   :  { %v403_v45 = vrot.slane %v402_v44, 4 }
 0x10b   :  { %311 = vmax.xlane.f32.xlu0 %v1662_v43 }
 0x10c   :  { %v404_v46 = vmax.f32 %v402_v44, %v403_v45  ;;  %v450_v44 = vstv %s279_s14 }
 0x10e   :  { %v405_v47 = vrot.slane %v404_v46, 2 }
 0x110   :  { %v406_v48 = vmax.f32 %v404_v46, %v405_v47 }
 0x112   :  { %v407_v49 = vrot.slane %v406_v48, 1 }
 0x114   :  { %v408_v50 = vmax.f32 %v406_v48, %v407_v49 }
 0x116   :  { %v409_v51 = vsub.f32 %v388_v19, %v408_v50  ;;  %v410_v52 = vsub.f32 %v389_v12, %v408_v50  ;;  %v411_v53 = vsub.f32 %v390_v34, %v408_v50  ;;  %v412_v54 = vsub.f32 %v391_v28, %v408_v50 }
 0x117   :  { %v413_v55 = vsub.f32 %v392_v27, %v408_v50  ;;  %v414_v56 = vsub.f32 %v393_v20, %v408_v50  ;;  %v415_v59 = vsub.f32 %v394_v38, %v408_v50  ;;  %v416_v60 = vsub.f32 %v395_v32, %v408_v50 }
 0x118   :  { %v417_v61 = vmul.f32 1.442695, %v409_v51  ;;  %v419_v62 = vmul.f32 1.442695, %v410_v52  ;;  %v421_v63 = vmul.f32 1.442695, %v411_v53 }
 0x119   :  { %v423_v0 = vmul.f32 1.442695, %v412_v54  ;;  %v425_v1 = vmul.f32 1.442695, %v413_v55  ;;  %v427_v3 = vmul.f32 1.442695, %v414_v56 }
 0x11a   :  { %1143 = vpow2.f32 %v417_v61  ;;  %v429_v4 = vmul.f32 1.442695, %v415_v59  ;;  %v431_v5 = vmul.f32 1.442695, %v416_v60 }
 0x11b   :  { %1145 = vpow2.f32 %v419_v62 }
 0x11c   :  { %1147 = vpow2.f32 %v421_v63 }
 0x11d   :  { %1149 = vpow2.f32 %v423_v0 }
 0x11e   :  { %1151 = vpow2.f32 %v425_v1 }
 0x11f   :  { %1153 = vpow2.f32 %v427_v3 }
 0x120   :  { %1155 = vpow2.f32 %v429_v4 }
 0x121   :  { %1157 = vpow2.f32 %v431_v5 }
 0x127   :  { %v1144_v7 = vpop.eup %1143 }
 0x128   :  { %v1146_v8 = vpop.eup %1145 }
 0x129   :  { %v433_v9 = vadd.f32 %v1146_v8, %v1144_v7  ;;  %v1148_v12 = vpop.eup %1147 }
 0x12a   :  { %v1150_v15 = vpop.eup %1149 }
 0x12b   :  { %v434_v13 = vadd.f32 %v1148_v12, %v433_v9  ;;  %v1152_v19 = vpop.eup %1151 }
 0x12c   :  { %v1154_v21 = vpop.eup %1153 }
 0x12d   :  { %v435_v16 = vadd.f32 %v1150_v15, %v434_v13  ;;  %v1156_v25 = vpop.eup %1155 }
 0x12e   :  { %v1158_v27 = vpop.eup %1157 }
 0x12f   :  { %v436_v20 = vadd.f32 %v1152_v19, %v435_v16 }
 0x131   :  { %v437_v24 = vadd.f32 %v1154_v21, %v436_v20 }
 0x133   :  { %v438_v26 = vadd.f32 %v1156_v25, %v437_v24 }
 0x135   :  { %v439_v28 = vadd.f32 %v1158_v27, %v438_v26 }
 0x137   :  { %v440_v29 = vrot.slane %v439_v28, 4 }
 0x139   :  { %v441_v31 = vadd.f32 %v440_v29, %v439_v28 }
 0x13b   :  { %v442_v32 = vrot.slane %v441_v31, 2 }
 0x13d   :  { %v443_v33 = vadd.f32 %v442_v32, %v441_v31 }
 0x13f   :  { %v444_v34 = vrot.slane %v443_v33, 1 }
 0x141   :  { %v445_v35 = vadd.f32 %v444_v34, %v443_v33 }
 0x143   :  { %1159 = vlog2.f32 %v445_v35 }
 0x150   :  { %v1160_v37 = vpop.eup %1159 }
 0x151   :  { %v447_v38 = vmul.f32 0.6931472, %v1160_v37 }
 0x153   :  { %v448_v42 = vadd.f32 %v447_v38, %v408_v50 }
 0x155   :  { %v449_v45 = vmul.f32 %v448_v42, %v1665_v41 }
 0x157   :  { %v1668_v46 = vmul.f32 %v450_v44, %v449_v45  }
 0x186   :  { %v1670_v47 = vpop.xlane.xlu1 %301 }
 0x187   :  { %v316_v48 = vsub.f32 %v1629_v11, %v1670_v47 }
 0x188   :  { %v1674_v49 = vpop.xlane.xlu0 %299 }
 0x189   :  { %v325_v51 = vmul.f32 1.442695, %v316_v48  ;;  %v315_v52 = vsub.f32 %v1637_v18, %v1674_v49 }
 0x18a   :  { %v1678_v53 = vpop.xlane.xlu1 %309 }
 0x18b   :  { %1161 = vpow2.f32 %v325_v51  ;;  %v323_v50 = vmul.f32 1.442695, %v315_v52  ;;  %v320_v54 = vsub.f32 %v1634_v17, %v1678_v53 }
 0x18c   :  { %v1682_v55 = vpop.xlane.xlu0 %307 }
 0x18d   :  { %1163 = vpow2.f32 %v323_v50  ;;  %v333_v56 = vmul.f32 1.442695, %v320_v54  ;;  %v319_v11 = vsub.f32 %v1649_v30, %v1682_v55 }
 0x18e   :  { %v1686_v59 = vpop.xlane.xlu1 %305 }
 0x18f   :  { %1165 = vpow2.f32 %v333_v56  ;;  %v331_v60 = vmul.f32 1.442695, %v319_v11  ;;  %v318_v18 = vsub.f32 %v1653_v36, %v1686_v59 }
 0x190   :  { %v1690_v61 = vpop.xlane.xlu0 %303 }
 0x191   :  { %1167 = vpow2.f32 %v331_v60  ;;  %v329_v62 = vmul.f32 1.442695, %v318_v18  ;;  %v317_v17 = vsub.f32 %v1656_v39, %v1690_v61 }
 0x192   :  { %v1694_v63 = vpop.xlane.xlu1 %313 }
 0x193   :  { %1169 = vpow2.f32 %v329_v62  ;;  %v327_v0 = vmul.f32 1.442695, %v317_v17  ;;  %v322_v30 = vsub.f32 %v1658_v40, %v1694_v63 }
 0x194   :  { %v1698_v1 = vpop.xlane.xlu0 %311 }
 0x195   :  { %1171 = vpow2.f32 %v327_v0  ;;  %v337_v3 = vmul.f32 1.442695, %v322_v30  ;;  %v321_v36 = vsub.f32 %v1662_v43, %v1698_v1 }
 0x197   :  { %1173 = vpow2.f32 %v337_v3  ;;  %v335_v4 = vmul.f32 1.442695, %v321_v36 }
 0x198   :  { %v1162_v5 = vpop.eup %1161 }
 0x199   :  { %1175 = vpow2.f32 %v335_v4  ;;  %341 = vadd.xlane.f32.xlu1 %v1162_v5 }
 0x19a   :  { %v1164_v39 = vpop.eup %1163 }
 0x19b   :  { %339 = vadd.xlane.f32.xlu0 %v1164_v39 }
 0x19c   :  { %v1166_v7 = vpop.eup %1165 }
 0x19d   :  { %349 = vadd.xlane.f32.xlu1 %v1166_v7 }
 0x19e   :  { %v1168_v8 = vpop.eup %1167 }
 0x19f   :  { %347 = vadd.xlane.f32.xlu0 %v1168_v8 }
 0x1a0   :  { %v1170_v9 = vpop.eup %1169 }
 0x1a1   :  { %345 = vadd.xlane.f32.xlu1 %v1170_v9 }
 0x1a2   :  { %v1172_v40 = vpop.eup %1171 }
 0x1a3   :  { %343 = vadd.xlane.f32.xlu0 %v1172_v40 }
 0x1a4   :  { %v1174_v12 = vpop.eup %1173 }
 0x1a5   :  { %353 = vadd.xlane.f32.xlu1 %v1174_v12 }
 0x1a6   :  { %v1176_v13 = vpop.eup %1175 }
 0x1a7   :  { %351 = vadd.xlane.f32.xlu0 %v1176_v13 }
 0x222   :  { %v342_v43 = vpop.xlane.xlu1 %341 }
 0x223   :  { %1177 = vlog2.f32 %v342_v43 }
 0x224   :  { %v340_v15 = vpop.xlane.xlu0 %339 }
 0x225   :  { %1179 = vlog2.f32 %v340_v15 }
 0x226   :  { %v350_v16 = vpop.xlane.xlu1 %349 }
 0x227   :  { %1181 = vlog2.f32 %v350_v16 }
 0x228   :  { %v348_v19 = vpop.xlane.xlu0 %347 }
 0x229   :  { %1183 = vlog2.f32 %v348_v19 }
 0x22a   :  { %v346_v20 = vpop.xlane.xlu1 %345 }
 0x22b   :  { %1185 = vlog2.f32 %v346_v20 }
 0x22c   :  { %v344_v21 = vpop.xlane.xlu0 %343 }
 0x22d   :  { %1187 = vlog2.f32 %v344_v21 }
 0x22e   :  { %v354_v24 = vpop.xlane.xlu1 %353 }
 0x22f   :  { %1189 = vlog2.f32 %v354_v24 }
 0x230   :  { %v1178_v25 = vpop.eup %1177  ;;  %v352_v26 = vpop.xlane.xlu0 %351 }
 0x231   :  { %v358_v27 = vmul.f32 0.6931472, %v1178_v25  ;;  %1191 = vlog2.f32 %v352_v26 }
 0x232   :  { %v1180_v28 = vpop.eup %1179 }
 0x233   :  { %v372_v29 = vadd.f32 %v358_v27, %v1670_v47  ;;  %v356_v31 = vmul.f32 0.6931472, %v1180_v28 }
 0x234   :  { %v1182_v32 = vpop.eup %1181 }
 0x235   :  { %v381_v33 = vmul.f32 %v1665_v41, %v372_v29   ;;  %v371_v34 = vadd.f32 %v356_v31, %v1674_v49  ;;  %v366_v35 = vmul.f32 0.6931472, %v1182_v32 }
 0x236   :  { %v1184_v37 = vpop.eup %1183 }
 0x237   :  { %v380_v38 = vmul.f32 %v1665_v41, %v371_v34   ;;  %v376_v42 = vadd.f32 %v366_v35, %v1678_v53  ;;  %v364_v44 = vmul.f32 0.6931472, %v1184_v37 }
 0x238   :  { %v1186_v45 = vpop.eup %1185 }
 0x239   :  { %v385_v48 = vmul.f32 %v1665_v41, %v376_v42   ;;  %v375_v51 = vadd.f32 %v364_v44, %v1682_v55  ;;  %v362_v52 = vmul.f32 0.6931472, %v1186_v45  ;;  %v2041_v39 = vmov %v380_v38 }
 0x23a   :  { %v1188_v47 = vpop.eup %1187 }
 0x23b   :  { %v384_v50 = vmul.f32 %v1665_v41, %v375_v51   ;;  %v374_v54 = vadd.f32 %v362_v52, %v1686_v59  ;;  %v360_v56 = vmul.f32 0.6931472, %v1188_v47  ;;  %v2033_v59 = vmov %v1668_v46 }
 0x23c   :  { %v1190_v49 = vpop.eup %1189 }
 0x23d   :  { %v383_v11 = vmul.f32 %v1665_v41, %v374_v54   ;;  %v373_v60 = vadd.f32 %v360_v56, %v1690_v61  ;;  %v370_v18 = vmul.f32 0.6931472, %v1190_v49  ;;  %v2037_v4 = vmov %v384_v50 }
 0x23e   :  { %v1192_v53 = vpop.eup %1191 }
 0x23f   :  { %v382_v62 = vmul.f32 %v1665_v41, %v373_v60   ;;  %v378_v17 = vadd.f32 %v370_v18, %v1694_v63  ;;  %v368_v0 = vmul.f32 0.6931472, %v1192_v53  ;;  %v2036_v63 = vmov %v385_v48 }
 0x240   :  { %v2038_v5 = vmov %v383_v11 }
 0x241   :  { %v387_v55 = vmul.f32 %v1665_v41, %v378_v17   ;;  %v377_v30 = vadd.f32 %v368_v0, %v1698_v1  ;;  %v2039_v1 = vmov %v382_v62  ;;  %916 = sbr.rel (%p946_p1) target bundleno = 930 (0x3a2), region = 61 }
 0x243   :  { %v386_v3 = vmul.f32 %v1665_v41, %v377_v30   ;;  %v2034_v61 = vmov %v387_v55  ;;  %v2040_v41 = vmov %v381_v33 }
 0x245   :  { %v2035_v36 = vmov %v386_v3 }
 0x246 LB: > { %s469_s18 = sld [smem:[#allocation6 + %s1471_s17]]  ;;  %s1471_s17 = sphi %s1759_s17, %s456_s17   ;;  %v1467_v38 = vphi %v380_v38, %v2051_v38   ;;  %v1463_v33 = vphi %v381_v33, %v2050_v33   ;;  %v1459_v62 = vphi %v382_v62, %v2049_v62   ;;  %v1455_v11 = vphi %v383_v11, %v2048_v11   ;;  %v1451_v50 = vphi %v384_v50, %v2047_v50   ;;  %v1447_v48 = vphi %v385_v48, %v2046_v48   ;;  %v1443_v3 = vphi %v386_v3, %v2045_v3   ;;  %v1439_v55 = vphi %v387_v55, %v2044_v55   ;;  %v1435_v46 = vphi %v1668_v46, %v2043_v46  }
 0x247   : > { %s468_s20 = sld [smem:[#allocation3 + %s1471_s17]] }
 0x248   : > { %s470_s21 = sld [smem:[#allocation8 + %s1471_s17]]  ;;  %s456_s17 = sadd.s32 1, %s1471_s17  }
 0x249   : > { %p455_p2 = scmp.ge.s32.totalorder %s456_s17, %s2025_s0 }
 0x24c   : > { %s471_s19 = ssub.f32 0.0, %s469_s18  ;;  %v482_v7 = vstv %s469_s18 }
 0x24d   : > { %v483_v8 = vmul.f32 %v1435_v46, %v482_v7  ;;  %v582_v9 = vmul.f32 %v1467_v38, %v482_v7  ;;  %v584_v40 = vmul.f32 %v1459_v62, %v482_v7  ;;  %v583_v13 = vmul.f32 %v1463_v33, %v482_v7  ;;  %s481_s22 = ssub.f32 0.0, %s468_s20 }
 0x24e   : > { %v472_v12 = vstv %s471_s19  ;;  %v585_v43 = vmul.f32 %v1455_v11, %v482_v7  ;;  %v586_v15 = vmul.f32 %v1451_v50, %v482_v7  ;;  %v587_v47 = vmul.f32 %v1447_v48, %v482_v7 }
 0x24f   : > { %v473_v16 = vmul.f32 %v472_v12, %v1621_v2  ;;  %v484_v19 = vadd.f32 -4.8520303, %v483_v8  ;;  %v590_v20 = vadd.f32 -4.158883, %v582_v9  ;;  %v475_v21 = vmul.f32 %v472_v12, %v1640_v22 }
 0x250   : > { %v592_v24 = vadd.f32 -4.158883, %v584_v40  ;;  %v474_v25 = vmul.f32 %v472_v12, %v1617_v57  ;;  %v591_v26 = vadd.f32 -4.158883, %v583_v13  ;;  %v476_v27 = vmul.f32 %v472_v12, %v1627_v10 }
 0x251   : > { %v1802_v28 = vadd.f32 %v484_v19, %v473_v16  ;;  %v598_v29 = vadd.f32 %v590_v20, %v473_v16  ;;  %v1804_v31 = vadd.f32 %v484_v19, %v475_v21  ;;  %v593_v32 = vadd.f32 -4.158883, %v585_v43 }
 0x252   : > { %v600_v34 = vadd.f32 %v592_v24, %v475_v21  ;;  %v1806_v35 = vadd.f32 %v484_v19, %v474_v25  ;;  %v599_v37 = vadd.f32 %v591_v26, %v474_v25  ;;  %v1808_v42 = vadd.f32 %v484_v19, %v476_v27 }
 0x253   : > { %493 = vmax.xlane.f32.xlu0 %v1802_v28  ;;  %497 = vmax.xlane.f32.xlu1 %v1804_v31  ;;  %v601_v44 = vadd.f32 %v593_v32, %v476_v27  ;;  %v477_v45 = vmul.f32 %v472_v12, %v1625_v6  ;;  %v594_v51 = vadd.f32 -4.158883, %v586_v15  ;;  %v478_v52 = vmul.f32 %v472_v12, %v1619_v58 }
 0x254   : > { %v588_v54 = vmul.f32 %v1443_v3, %v482_v7  ;;  %v589_v49 = vmul.f32 %v1439_v55, %v482_v7  ;;  %v595_v60 = vadd.f32 -4.158883, %v587_v47  ;;  %v479_v18 = vmul.f32 %v472_v12, %v1642_v23 }
 0x255   : > { %v602_v56 = vadd.f32 %v594_v51, %v477_v45  ;;  %v480_v17 = vmul.f32 %v472_v12, %v1632_v14  ;;  %v1821_v0 = vadd.f32 %v484_v19, %v477_v45  ;;  %v1823_v59 = vadd.f32 %v484_v19, %v478_v52 }
 0x256   : > { %v596_v53 = vadd.f32 -4.158883, %v588_v54  ;;  %v597_v61 = vadd.f32 -4.158883, %v589_v49  ;;  %v603_v36 = vadd.f32 %v595_v60, %v478_v52  ;;  %v1827_v41 = vadd.f32 %v484_v19, %v479_v18 }
 0x257   : > { %495 = vmax.xlane.f32.xlu0 %v1806_v35  ;;  %499 = vmax.xlane.f32.xlu1 %v1808_v42  ;;  %v606_v30 = vmax.f32 %v598_v29, %v602_v56  ;;  %v1829_v39 = vadd.f32 %v484_v19, %v480_v17 }
 0x258   : > { %v604_v63 = vadd.f32 %v596_v53, %v479_v18  ;;  %v605_v4 = vadd.f32 %v597_v61, %v480_v17  ;;  %v607_v5 = vmax.f32 %v599_v37, %v603_v36 }
 0x25a   : > { %v608_v1 = vmax.f32 %v600_v34, %v604_v63  ;;  %v609_v7 = vmax.f32 %v601_v44, %v605_v4  ;;  %v610_v8 = vmax.f32 %v606_v30, %v607_v5 }
 0x25b   : > { %501 = vmax.xlane.f32.xlu0 %v1821_v0  ;;  %503 = vmax.xlane.f32.xlu1 %v1823_v59 }
 0x25c   : > { %v611_v9 = vmax.f32 %v608_v1, %v609_v7 }
 0x25e   : > { %v612_v40 = vmax.f32 %v610_v8, %v611_v9 }
 0x25f   : > { %505 = vmax.xlane.f32.xlu0 %v1827_v41  ;;  %507 = vmax.xlane.f32.xlu1 %v1829_v39 }
 0x260   : > { %v613_v12 = vrot.slane %v612_v40, 4 }
 0x262   : > { %v614_v13 = vmax.f32 %v612_v40, %v613_v12 }
 0x264   : > { %v615_v43 = vrot.slane %v614_v13, 2 }
 0x266   : > { %v616_v15 = vmax.f32 %v614_v13, %v615_v43 }
 0x268   : > { %v617_v16 = vrot.slane %v616_v15, 1 }
 0x26a   : > { %v618_v20 = vmax.f32 %v616_v15, %v617_v16 }
 0x26c   : > { %v619_v21 = vsub.f32 %v598_v29, %v618_v20  ;;  %v620_v24 = vsub.f32 %v599_v37, %v618_v20  ;;  %v621_v25 = vsub.f32 %v600_v34, %v618_v20  ;;  %v622_v26 = vsub.f32 %v601_v44, %v618_v20 }
 0x26d   : > { %v623_v19 = vsub.f32 %v602_v56, %v618_v20  ;;  %v624_v27 = vsub.f32 %v603_v36, %v618_v20  ;;  %v625_v32 = vsub.f32 %v604_v63, %v618_v20  ;;  %v626_v45 = vsub.f32 %v605_v4, %v618_v20 }
 0x26e   : > { %v627_v51 = vmul.f32 1.442695, %v619_v21  ;;  %v629_v52 = vmul.f32 1.442695, %v620_v24  ;;  %v631_v47 = vmul.f32 1.442695, %v621_v25  ;;  %v660_v25 = vstv %s470_s21 }
 0x26f   : > { %v633_v54 = vmul.f32 1.442695, %v622_v26  ;;  %v635_v49 = vmul.f32 1.442695, %v623_v19  ;;  %v637_v60 = vmul.f32 1.442695, %v624_v27  ;;  %v1835_v26 = vstv %s481_s22 }
 0x270   : > { %1193 = vpow2.f32 %v627_v51  ;;  %v639_v18 = vmul.f32 1.442695, %v625_v32  ;;  %v641_v29 = vmul.f32 1.442695, %v626_v45 }
 0x271   : > { %1195 = vpow2.f32 %v629_v52 }
 0x272   : > { %1197 = vpow2.f32 %v631_v47 }
 0x273   : > { %1199 = vpow2.f32 %v633_v54 }
 0x274   : > { %1201 = vpow2.f32 %v635_v49 }
 0x275   : > { %1203 = vpow2.f32 %v637_v60 }
 0x276   : > { %1205 = vpow2.f32 %v639_v18 }
 0x277   : > { %1207 = vpow2.f32 %v641_v29 }
 0x27d   : > { %v1194_v34 = vpop.eup %1193 }
 0x27e   : > { %v1196_v37 = vpop.eup %1195 }
 0x27f   : > { %v1198_v44 = vpop.eup %1197  ;;  %v643_v56 = vadd.f32 %v1196_v37, %v1194_v34 }
 0x280   : > { %v1200_v53 = vpop.eup %1199 }
 0x281   : > { %v644_v17 = vadd.f32 %v1198_v44, %v643_v56  ;;  %v1202_v30 = vpop.eup %1201 }
 0x282   : > { %v1204_v36 = vpop.eup %1203 }
 0x283   : > { %v645_v61 = vadd.f32 %v1200_v53, %v644_v17  ;;  %v1206_v4 = vpop.eup %1205 }
 0x284   : > { %v1208_v1 = vpop.eup %1207 }
 0x285   : > { %v646_v63 = vadd.f32 %v1202_v30, %v645_v61 }
 0x287   : > { %v647_v5 = vadd.f32 %v1204_v36, %v646_v63 }
 0x289   : > { %v648_v7 = vadd.f32 %v1206_v4, %v647_v5 }
 0x28b   : > { %v649_v8 = vadd.f32 %v1208_v1, %v648_v7 }
 0x28d   : > { %v650_v9 = vrot.slane %v649_v8, 4 }
 0x28f   : > { %v651_v40 = vadd.f32 %v650_v9, %v649_v8 }
 0x291   : > { %v652_v12 = vrot.slane %v651_v40, 2 }
 0x293   : > { %v653_v13 = vadd.f32 %v652_v12, %v651_v40 }
 0x295   : > { %v654_v43 = vrot.slane %v653_v13, 1 }
 0x297   : > { %v655_v15 = vadd.f32 %v654_v43, %v653_v13 }
 0x299   : > { %1209 = vlog2.f32 %v655_v15 }
 0x2a6   : > { %v1210_v16 = vpop.eup %1209 }
 0x2a7   : > { %v657_v21 = vmul.f32 0.6931472, %v1210_v16 }
 0x2a9   : > { %v658_v24 = vadd.f32 %v657_v21, %v618_v20 }
 0x2ab   : > { %v659_v19 = vmul.f32 %v658_v24, %v1835_v26 }
 0x2ad   : > { %v661_v27 = vmul.f32 %v660_v25, %v659_v19 }
 0x2af   : > { %v678_v32 = vadd.f32 %v1435_v46, %v661_v27 }
 0x2b1   : > { %v1839_v46 = vmul.f32 0.5, %v678_v32  }
 0x2b3   : > { %v2042_v45 = vmov %v1839_v46 }
 0x2dc   : > { %v1841_v51 = vpop.xlane.xlu0 %493  ;;  %v1843_v52 = vpop.xlane.xlu1 %497 }
 0x2dd   : > { %v509_v47 = vsub.f32 %v1802_v28, %v1841_v51  ;;  %v511_v20 = vsub.f32 %v1804_v31, %v1843_v52 }
 0x2df   : > { %v517_v54 = vmul.f32 1.442695, %v509_v47  ;;  %v521_v49 = vmul.f32 1.442695, %v511_v20 }
 0x2e0   : > { %v1849_v60 = vpop.xlane.xlu0 %495  ;;  %v1851_v18 = vpop.xlane.xlu1 %499 }
 0x2e1   : > { %1211 = vpow2.f32 %v517_v54  ;;  %v510_v46 = vsub.f32 %v1806_v35, %v1849_v60  ;;  %v512_v29 = vsub.f32 %v1808_v42, %v1851_v18 }
 0x2e2   : > { %1213 = vpow2.f32 %v521_v49 }
 0x2e3   : > { %v519_v34 = vmul.f32 1.442695, %v510_v46  ;;  %v523_v37 = vmul.f32 1.442695, %v512_v29 }
 0x2e4   : > { %v1857_v28 = vpop.xlane.xlu0 %501  ;;  %v1859_v44 = vpop.xlane.xlu1 %503 }
 0x2e5   : > { %1215 = vpow2.f32 %v519_v34  ;;  %v513_v31 = vsub.f32 %v1821_v0, %v1857_v28  ;;  %v514_v56 = vsub.f32 %v1823_v59, %v1859_v44 }
 0x2e6   : > { %1217 = vpow2.f32 %v523_v37 }
 0x2e7   : > { %v525_v53 = vmul.f32 1.442695, %v513_v31  ;;  %v527_v35 = vmul.f32 1.442695, %v514_v56 }
 0x2e8   : > { %v1865_v17 = vpop.xlane.xlu0 %505  ;;  %v1867_v42 = vpop.xlane.xlu1 %507 }
 0x2e9   : > { %1219 = vpow2.f32 %v525_v53  ;;  %v515_v30 = vsub.f32 %v1827_v41, %v1865_v17  ;;  %v516_v61 = vsub.f32 %v1829_v39, %v1867_v42 }
 0x2ea   : > { %1221 = vpow2.f32 %v527_v35 }
 0x2eb   : > { %v529_v36 = vmul.f32 1.442695, %v515_v30  ;;  %v531_v0 = vmul.f32 1.442695, %v516_v61 }
 0x2ed   : > { %1223 = vpow2.f32 %v529_v36 }
 0x2ee   : > { %v1212_v63 = vpop.eup %1211  ;;  %1225 = vpow2.f32 %v531_v0 }
 0x2ef   : > { %533 = vadd.xlane.f32.xlu0 %v1212_v63  ;;  %v1214_v59 = vpop.eup %1213 }
 0x2f2   : > { %v1216_v4 = vpop.eup %1215 }
 0x2f3   : > { %537 = vadd.xlane.f32.xlu0 %v1214_v59  ;;  %535 = vadd.xlane.f32.xlu1 %v1216_v4  ;;  %v1218_v5 = vpop.eup %1217 }
 0x2f6   : > { %v1220_v1 = vpop.eup %1219 }
 0x2f7   : > { %539 = vadd.xlane.f32.xlu1 %v1218_v5  ;;  %541 = vadd.xlane.f32.xlu0 %v1220_v1  ;;  %v1222_v7 = vpop.eup %1221 }
 0x2fa   : > { %v1224_v41 = vpop.eup %1223 }
 0x2fb   : > { %543 = vadd.xlane.f32.xlu1 %v1222_v7  ;;  %545 = vadd.xlane.f32.xlu0 %v1224_v41  ;;  %v1226_v39 = vpop.eup %1225 }
 0x2ff   : > { %547 = vadd.xlane.f32.xlu1 %v1226_v39 }
 0x378   : > { %v534_v8 = vpop.xlane.xlu0 %533 }
 0x379   : > { %1227 = vlog2.f32 %v534_v8 }
 0x37c   : > { %v536_v9 = vpop.xlane.xlu1 %535  ;;  %v538_v40 = vpop.xlane.xlu0 %537 }
 0x37d   : > { %1229 = vlog2.f32 %v536_v9 }
 0x37e   : > { %1231 = vlog2.f32 %v538_v40 }
 0x380   : > { %v540_v12 = vpop.xlane.xlu1 %539  ;;  %v542_v13 = vpop.xlane.xlu0 %541 }
 0x381   : > { %1233 = vlog2.f32 %v540_v12 }
 0x382   : > { %1235 = vlog2.f32 %v542_v13 }
 0x384   : > { %v544_v43 = vpop.xlane.xlu1 %543  ;;  %v546_v15 = vpop.xlane.xlu0 %545 }
 0x385   : > { %1237 = vlog2.f32 %v544_v43 }
 0x386   : > { %v1228_v16 = vpop.eup %1227  ;;  %1239 = vlog2.f32 %v546_v15 }
 0x387   : > { %v550_v21 = vmul.f32 0.6931472, %v1228_v16 }
 0x388   : > { %v548_v24 = vpop.xlane.xlu1 %547 }
 0x389   : > { %v565_v25 = vadd.f32 %v550_v21, %v1841_v51  ;;  %1241 = vlog2.f32 %v548_v24 }
 0x38a   : > { %v1230_v19 = vpop.eup %1229 }
 0x38b   : > { %v1232_v27 = vpop.eup %1231  ;;  %v574_v32 = vmul.f32 %v1835_v26, %v565_v25  ;;  %v552_v47 = vmul.f32 0.6931472, %v1230_v19 }
 0x38c   : > { %v554_v20 = vmul.f32 0.6931472, %v1232_v27 }
 0x38d   : > { %v662_v54 = vadd.f32 %v1467_v38, %v574_v32  ;;  %v566_v49 = vadd.f32 %v552_v47, %v1849_v60 }
 0x38e   : > { %v1234_v46 = vpop.eup %1233  ;;  %v567_v29 = vadd.f32 %v554_v20, %v1843_v52 }
 0x38f   : > { %v1236_v34 = vpop.eup %1235  ;;  %v670_v37 = vmul.f32 0.5, %v662_v54   ;;  %v575_v31 = vmul.f32 %v1835_v26, %v566_v49  ;;  %v556_v56 = vmul.f32 0.6931472, %v1234_v46  ;;  %v2043_v46 = vmov %v2042_v45 }
 0x390   : > { %v576_v51 = vmul.f32 %v1835_v26, %v567_v29  ;;  %v558_v53 = vmul.f32 0.6931472, %v1236_v34 }
 0x391   : > { %v663_v35 = vadd.f32 %v1463_v33, %v575_v31  ;;  %v568_v30 = vadd.f32 %v556_v56, %v1851_v18 }
 0x392   : > { %v1238_v61 = vpop.eup %1237  ;;  %v664_v38 = vadd.f32 %v1459_v62, %v576_v51  ;;  %v569_v60 = vadd.f32 %v558_v53, %v1857_v28 }
 0x393   : > { %v1240_v36 = vpop.eup %1239  ;;  %v671_v0 = vmul.f32 0.5, %v663_v35   ;;  %v577_v52 = vmul.f32 %v1835_v26, %v568_v30  ;;  %v560_v63 = vmul.f32 0.6931472, %v1238_v61 }
 0x394   : > { %v672_v1 = vmul.f32 0.5, %v664_v38   ;;  %v578_v59 = vmul.f32 %v1835_v26, %v569_v60  ;;  %v562_v4 = vmul.f32 0.6931472, %v1240_v36  ;;  %v2051_v38 = vmov %v670_v37 }
 0x395   : > { %v665_v5 = vadd.f32 %v1455_v11, %v577_v52  ;;  %v570_v33 = vadd.f32 %v560_v63, %v1859_v44 }
 0x396   : > { %v1242_v7 = vpop.eup %1241  ;;  %v666_v18 = vadd.f32 %v1451_v50, %v578_v59  ;;  %v571_v62 = vadd.f32 %v562_v4, %v1865_v17  ;;  %v2052_v59 = vmov (%p455_p2), %v2042_v45 }
 0x397   : > { %v673_v41 = vmul.f32 0.5, %v665_v5   ;;  %v579_v28 = vmul.f32 %v1835_v26, %v570_v33  ;;  %v564_v39 = vmul.f32 0.6931472, %v1242_v7  ;;  %v2050_v33 = vmov %v671_v0 }
 0x398   : > { %v674_v8 = vmul.f32 0.5, %v666_v18   ;;  %v580_v9 = vmul.f32 %v1835_v26, %v571_v62  ;;  %v2049_v62 = vmov %v672_v1 }
 0x399   : > { %v667_v40 = vadd.f32 %v1447_v48, %v579_v28  ;;  %v572_v12 = vadd.f32 %v564_v39, %v1867_v42  ;;  %v2057_v5 = vmov (%p455_p2), %v673_v41  ;;  %v2059_v39 = vmov (%p455_p2), %v670_v37 }
 0x39a   : > { %v668_v11 = vadd.f32 %v1443_v3, %v580_v9  ;;  %v2056_v4 = vmov (%p455_p2), %v674_v8 }
 0x39b   : > { %v675_v13 = vmul.f32 0.5, %v667_v40   ;;  %v581_v44 = vmul.f32 %v1835_v26, %v572_v12 }
 0x39c   : > { %v676_v43 = vmul.f32 0.5, %v668_v11   ;;  %v2048_v11 = vmov %v673_v41  ;;  %v2058_v41 = vmov (%p455_p2), %v671_v0 }
 0x39d   : > { %v669_v50 = vadd.f32 %v1439_v55, %v581_v44  ;;  %v2046_v48 = vmov %v675_v13  ;;  %458 = sbr.rel (!%p455_p2) target bundleno = 582 (0x246), region = 67  ;;  %v2055_v63 = vmov (%p455_p2), %v675_v13 }
 0x39e   : > { %v2045_v3 = vmov %v676_v43  ;;  %v2054_v36 = vmov (%p455_p2), %v676_v43 }
 0x39f   : > { %v677_v17 = vmul.f32 0.5, %v669_v50   ;;  %v2047_v50 = vmov %v674_v8 }
 0x3a1   : > { %v2044_v55 = vmov %v677_v17  ;;  %v2053_v61 = vmov (%p455_p2), %v677_v17 }
 0x3a2 PF:  { %v680_v48 = vmul.f32 -1000000.0, %v1621_v2  ;;  %v688_v55 = vmul.f32 1000000.0, %v1475_v59  ;;  %v786_v3 = vmul.f32 1000000.0, %v1507_v39  ;;  %v1507_v39 = vphi %v2041_v39, %v2059_v39   ;;  %v1503_v41 = vphi %v2040_v41, %v2058_v41   ;;  %v1499_v1 = vphi %v2039_v1, %v672_v1   ;;  %v1495_v5 = vphi %v2038_v5, %v2057_v5   ;;  %v1491_v4 = vphi %v2037_v4, %v2056_v4   ;;  %v1487_v63 = vphi %v2036_v63, %v2055_v63   ;;  %v1483_v36 = vphi %v2035_v36, %v2054_v36   ;;  %v1479_v61 = vphi %v2034_v61, %v2053_v61   ;;  %v1475_v59 = vphi %v2033_v59, %v2052_v59  }
 0x3a3   :  { %v682_v26 = vmul.f32 -1000000.0, %v1640_v22  ;;  %v788_v45 = vmul.f32 1000000.0, %v1499_v1  ;;  %v681_v42 = vmul.f32 -1000000.0, %v1617_v57 }
 0x3a4   :  { %v689_v15 = vadd.f32 -4.8520303, %v688_v55  ;;  %v787_v16 = vmul.f32 1000000.0, %v1503_v41  ;;  %v794_v21 = vadd.f32 -4.158883, %v786_v3 }
 0x3a5   :  { %v683_v24 = vmul.f32 -1000000.0, %v1627_v10  ;;  %v789_v25 = vmul.f32 1000000.0, %v1495_v5  ;;  %v796_v32 = vadd.f32 -4.158883, %v788_v45 }
 0x3a6   :  { %v1954_v19 = vadd.f32 %v689_v15, %v680_v48  ;;  %v1956_v27 = vadd.f32 %v689_v15, %v682_v26  ;;  %v1958_v47 = vadd.f32 %v689_v15, %v681_v42  ;;  %v795_v2 = vadd.f32 -4.158883, %v787_v16  ;;  %s1512_s0 = smov [#allocation9]  }
 0x3a7   :  { %v1962_v22 = vadd.f32 %v689_v15, %v683_v24  ;;  %v684_v57 = vmul.f32 -1000000.0, %v1625_v6  ;;  %v790_v20 = vmul.f32 1000000.0, %v1491_v4  ;;  %v685_v10 = vmul.f32 -1000000.0, %v1619_v58 }
 0x3a8   :  { %698 = vmax.xlane.f32.xlu0 %v1954_v19  ;;  %702 = vmax.xlane.f32.xlu1 %v1956_v27  ;;  %v802_v54 = vadd.f32 %v794_v21, %v680_v48  ;;  %v797_v49 = vadd.f32 -4.158883, %v789_v25  ;;  %v791_v46 = vmul.f32 1000000.0, %v1487_v63  ;;  %v804_v29 = vadd.f32 %v796_v32, %v682_v26  ;;  %s895_s25 = sshll.u32 %s1512_s0, 4  ;;  %s896_s25 = int_to_ptr.vmem [resolvable:$true] %s895_s25 }
 0x3a9   :  { %v803_v34 = vadd.f32 %v795_v2, %v681_v42  ;;  %v798_v37 = vadd.f32 -4.158883, %v790_v20  ;;  %v792_v31 = vmul.f32 1000000.0, %v1483_v36  ;;  %v1966_v56 = vadd.f32 %v689_v15, %v684_v57  ;;  %s1331_s26 = scalar_lea.vmem %s896_s25, 16  ;;  %s1335_s5 = scalar_lea.vmem %s896_s25, 32 }
 0x3aa   :  { %v799_v51 = vadd.f32 -4.158883, %v791_v46  ;;  %v686_v53 = vmul.f32 -1000000.0, %v1642_v23  ;;  %v793_v35 = vmul.f32 1000000.0, %v1479_v61  ;;  %v1971_v30 = vadd.f32 %v689_v15, %v685_v10  ;;  %p1332_p3 = scmp.ne.s32.totalorder %s896_s25, %s1331_s26  ;;  %p1336_p4 = scmp.lt.s32.totalorder %s896_s25, %s896_s25 }
 0x3ab   :  { %v806_v6 = vadd.f32 %v798_v37, %v684_v57  ;;  %v800_v58 = vadd.f32 -4.158883, %v792_v31  ;;  %v687_v38 = vmul.f32 -1000000.0, %v1632_v14  ;;  %v805_v60 = vadd.f32 %v797_v49, %v683_v24  ;;  %p1337_p5 = scmp.lt.s32.totalorder %s1335_s5, %s1331_s26 }
 0x3ac   :  { %700 = vmax.xlane.f32.xlu0 %v1958_v47  ;;  %704 = vmax.xlane.f32.xlu1 %v1962_v22  ;;  %v807_v0 = vadd.f32 %v799_v51, %v685_v10  ;;  %v801_v52 = vadd.f32 -4.158883, %v793_v35  ;;  %v1976_v23 = vadd.f32 %v689_v15, %v686_v53  ;;  %vm887_vm1 = vcmask 0  }
 0x3ad   :  { %v810_v36 = vmax.f32 %v802_v54, %v806_v6  ;;  %v808_v63 = vadd.f32 %v800_v58, %v686_v53  ;;  %v1978_v4 = vadd.f32 %v689_v15, %v687_v38  ;;  %p1338_p6 = por %p1337_p5, %p1336_p4 }
 0x3ae   :  { %v811_v1 = vmax.f32 %v803_v34, %v807_v0  ;;  %v809_v59 = vadd.f32 %v801_v52, %v687_v38 }
 0x3af   :  { %v812_v61 = vmax.f32 %v804_v29, %v808_v63  ;;  %p1339_p7 = pnand %p1338_p6, %p1332_p3 }
 0x3b0   :  { %706 = vmax.xlane.f32.xlu0 %v1966_v56  ;;  %708 = vmax.xlane.f32.xlu1 %v1971_v30  ;;  %v814_v5 = vmax.f32 %v810_v36, %v811_v1  ;;  %v813_v33 = vmax.f32 %v805_v60, %v809_v59 }
 0x3b2   :  { %v815_v7 = vmax.f32 %v812_v61, %v813_v33 }
 0x3b4   :  { %710 = vmax.xlane.f32.xlu0 %v1976_v23  ;;  %712 = vmax.xlane.f32.xlu1 %v1978_v4  ;;  %v816_v14 = vmax.f32 %v814_v5, %v815_v7 }
 0x3b6   :  { %v817_v18 = vrot.slane %v816_v14, 4 }
 0x3b8   :  { %v818_v62 = vmax.f32 %v816_v14, %v817_v18 }
 0x3ba   :  { %v819_v41 = vrot.slane %v818_v62, 2 }
 0x3bc   :  { %v820_v28 = vmax.f32 %v818_v62, %v819_v41 }
 0x3be   :  { %v821_v39 = vrot.slane %v820_v28, 1 }
 0x3c0   :  { %v822_v8 = vmax.f32 %v820_v28, %v821_v39 }
 0x3c2   :  { %v823_v9 = vsub.f32 %v802_v54, %v822_v8  ;;  %v824_v40 = vsub.f32 %v803_v34, %v822_v8  ;;  %v825_v12 = vsub.f32 %v804_v29, %v822_v8  ;;  %v826_v11 = vsub.f32 %v805_v60, %v822_v8 }
 0x3c3   :  { %v827_v13 = vsub.f32 %v806_v6, %v822_v8  ;;  %v828_v17 = vsub.f32 %v807_v0, %v822_v8  ;;  %v829_v55 = vsub.f32 %v808_v63, %v822_v8  ;;  %v830_v26 = vsub.f32 %v809_v59, %v822_v8 }
 0x3c4   :  { %v831_v44 = vmul.f32 1.442695, %v823_v9  ;;  %v833_v43 = vmul.f32 1.442695, %v824_v40  ;;  %v835_v50 = vmul.f32 1.442695, %v825_v12 }
 0x3c5   :  { %v837_v48 = vmul.f32 1.442695, %v826_v11  ;;  %v839_v3 = vmul.f32 1.442695, %v827_v13  ;;  %v841_v45 = vmul.f32 1.442695, %v828_v17 }
 0x3c6   :  { %1243 = vpow2.f32 %v831_v44  ;;  %v843_v42 = vmul.f32 1.442695, %v829_v55  ;;  %v845_v15 = vmul.f32 1.442695, %v830_v26 }
 0x3c7   :  { %1245 = vpow2.f32 %v833_v43 }
 0x3c8   :  { %1247 = vpow2.f32 %v835_v50 }
 0x3c9   :  { %1249 = vpow2.f32 %v837_v48 }
 0x3ca   :  { %1251 = vpow2.f32 %v839_v3 }
 0x3cb   :  { %1253 = vpow2.f32 %v841_v45 }
 0x3cc   :  { %1255 = vpow2.f32 %v843_v42 }
 0x3cd   :  { %1257 = vpow2.f32 %v845_v15 }
 0x3d3   :  { %v1244_v16 = vpop.eup %1243 }
 0x3d4   :  { %v1246_v21 = vpop.eup %1245 }
 0x3d5   :  { %v1248_v24 = vpop.eup %1247  ;;  %v847_v25 = vadd.f32 %v1246_v21, %v1244_v16 }
 0x3d6   :  { %v1250_v32 = vpop.eup %1249 }
 0x3d7   :  { %v848_v2 = vadd.f32 %v1248_v24, %v847_v25  ;;  %v1252_v57 = vpop.eup %1251 }
 0x3d8   :  { %v1254_v10 = vpop.eup %1253 }
 0x3d9   :  { %v849_v20 = vadd.f32 %v1250_v32, %v848_v2  ;;  %v1256_v49 = vpop.eup %1255 }
 0x3da   :  { %v1258_v29 = vpop.eup %1257 }
 0x3db   :  { %v850_v54 = vadd.f32 %v1252_v57, %v849_v20 }
 0x3dd   :  { %v851_v46 = vadd.f32 %v1254_v10, %v850_v54 }
 0x3df   :  { %v852_v34 = vadd.f32 %v1256_v49, %v851_v46 }
 0x3e1   :  { %v853_v37 = vadd.f32 %v1258_v29, %v852_v34 }
 0x3e3   :  { %v854_v31 = vrot.slane %v853_v37, 4 }
 0x3e5   :  { %v855_v51 = vadd.f32 %v854_v31, %v853_v37 }
 0x3e7   :  { %v856_v53 = vrot.slane %v855_v51, 2 }
 0x3e9   :  { %v857_v35 = vadd.f32 %v856_v53, %v855_v51 }
 0x3eb   :  { %v858_v6 = vrot.slane %v857_v35, 1 }
 0x3ed   :  { %v859_v58 = vadd.f32 %v858_v6, %v857_v35 }
 0x3ef   :  { %1259 = vlog2.f32 %v859_v58 }
 0x3fc   :  { %v1260_v38 = vpop.eup %1259 }
 0x3fd   :  { %v861_v60 = vmul.f32 0.6931472, %v1260_v38 }
 0x3ff   :  { %v862_v0 = vadd.f32 %v861_v60, %v822_v8 }
 0x401   :  { %v863_v52 = vmul.f32 -1e-06, %v862_v0 }
 0x403   :  { %v864_v61 = vmul.f32 0.999999, %v863_v52 }
 0x405   :  { %v879_v41 = vmul.f32 -1.0, %v864_v61 }
 0x407   :  { %v880_v40 = vmul.f32 1.442695, %v879_v41 }
 0x431   :  { %v1982_v36 = vpop.xlane.xlu0 %698  ;;  %v1984_v63 = vpop.xlane.xlu1 %702 }
 0x432   :  { %v714_v1 = vsub.f32 %v1954_v19, %v1982_v36  ;;  %v716_v59 = vsub.f32 %v1956_v27, %v1984_v63 }
 0x434   :  { %v722_v5 = vmul.f32 1.442695, %v714_v1  ;;  %v726_v33 = vmul.f32 1.442695, %v716_v59 }
 0x435   :  { %v1990_v7 = vpop.xlane.xlu0 %700  ;;  %v1992_v14 = vpop.xlane.xlu1 %704 }
 0x436   :  { %1261 = vpow2.f32 %v722_v5  ;;  %v715_v18 = vsub.f32 %v1958_v47, %v1990_v7  ;;  %v717_v62 = vsub.f32 %v1962_v22, %v1992_v14 }
 0x437   :  { %1263 = vpow2.f32 %v726_v33 }
 0x438   :  { %v724_v19 = vmul.f32 1.442695, %v715_v18  ;;  %v728_v28 = vmul.f32 1.442695, %v717_v62 }
 0x439   :  { %v1998_v39 = vpop.xlane.xlu0 %706  ;;  %v2000_v27 = vpop.xlane.xlu1 %708 }
 0x43a   :  { %1265 = vpow2.f32 %v724_v19  ;;  %v718_v8 = vsub.f32 %v1966_v56, %v1998_v39  ;;  %v719_v9 = vsub.f32 %v1971_v30, %v2000_v27 }
 0x43b   :  { %1267 = vpow2.f32 %v728_v28 }
 0x43c   :  { %v730_v47 = vmul.f32 1.442695, %v718_v8  ;;  %v732_v12 = vmul.f32 1.442695, %v719_v9 }
 0x43d   :  { %v2006_v22 = vpop.xlane.xlu0 %710  ;;  %v2008_v11 = vpop.xlane.xlu1 %712 }
 0x43e   :  { %1269 = vpow2.f32 %v730_v47  ;;  %v720_v13 = vsub.f32 %v1976_v23, %v2006_v22  ;;  %v721_v44 = vsub.f32 %v1978_v4, %v2008_v11 }
 0x43f   :  { %1271 = vpow2.f32 %v880_v40 }
 0x440   :  { %1273 = vpow2.f32 %v732_v12  ;;  %v734_v56 = vmul.f32 1.442695, %v720_v13  ;;  %v736_v43 = vmul.f32 1.442695, %v721_v44 }
 0x442   :  { %1275 = vpow2.f32 %v734_v56 }
 0x443   :  { %v1262_v30 = vpop.eup %1261  ;;  %1277 = vpow2.f32 %v736_v43 }
 0x444   :  { %738 = vadd.xlane.f32.xlu0 %v1262_v30  ;;  %v1264_v50 = vpop.eup %1263 }
 0x447   :  { %v1266_v17 = vpop.eup %1265 }
 0x448   :  { %742 = vadd.xlane.f32.xlu0 %v1264_v50  ;;  %740 = vadd.xlane.f32.xlu1 %v1266_v17  ;;  %v1268_v48 = vpop.eup %1267 }
 0x44b   :  { %v1270_v55 = vpop.eup %1269 }
 0x44c   :  { %v1272_v3 = vpop.eup %1271  ;;  %744 = vadd.xlane.f32.xlu1 %v1268_v48  ;;  %746 = vadd.xlane.f32.xlu0 %v1270_v55 }
 0x44d   :  { %v1274_v23 = vpop.eup %1273  ;;  %v882_v4 = vsub.f32 1.0, %v1272_v3 }
 0x44f   :  { %v1276_v26 = vpop.eup %1275 }
 0x450   :  { %748 = vadd.xlane.f32.xlu1 %v1274_v23  ;;  %750 = vadd.xlane.f32.xlu0 %v1276_v26  ;;  %v1278_v45 = vpop.eup %1277 }
 0x454   :  { %752 = vadd.xlane.f32.xlu1 %v1278_v45  ;;  %883 = vadd.xlane.f32.xlu0 %v882_v4 }
 0x4cd   :  { %v739_v42 = vpop.xlane.xlu0 %738 }
 0x4ce   :  { %1279 = vlog2.f32 %v739_v42 }
 0x4d1   :  { %v741_v15 = vpop.xlane.xlu1 %740  ;;  %v743_v16 = vpop.xlane.xlu0 %742 }
 0x4d2   :  { %1281 = vlog2.f32 %v741_v15 }
 0x4d3   :  { %1283 = vlog2.f32 %v743_v16 }
 0x4d5   :  { %v745_v21 = vpop.xlane.xlu1 %744  ;;  %v747_v24 = vpop.xlane.xlu0 %746 }
 0x4d6   :  { %1285 = vlog2.f32 %v745_v21 }
 0x4d7   :  { %1287 = vlog2.f32 %v747_v24 }
 0x4d9   :  { %v749_v25 = vpop.xlane.xlu1 %748  ;;  %v751_v32 = vpop.xlane.xlu0 %750 }
 0x4da   :  { %1289 = vlog2.f32 %v749_v25 }
 0x4db   :  { %v1280_v2 = vpop.eup %1279  ;;  %1291 = vlog2.f32 %v751_v32 }
 0x4dc   :  { %v755_v57 = vmul.f32 0.6931472, %v1280_v2 }
 0x4dd   :  { %v753_v20 = vpop.xlane.xlu1 %752  ;;  %v884_v30 = vpop.xlane.xlu0 %883 }
 0x4de   :  { %1293 = vlog2.f32 %v753_v20  ;;  %v770_v49 = vadd.f32 %v755_v57, %v1982_v36  ;;  %v885_v17 = vmul.f32 0.007812504, %v884_v30 }
 0x4df   :  { %v1282_v10 = vpop.eup %1281 }
 0x4e0   :  { %v1284_v54 = vpop.eup %1283  ;;  %v757_v46 = vmul.f32 0.6931472, %v1282_v10  ;;  %v778_v53 = vmul.f32 -1e-06, %v770_v49 }
 0x4e1   :  { %v759_v29 = vmul.f32 0.6931472, %v1284_v54 }
 0x4e2   :  { %v771_v34 = vadd.f32 %v757_v46, %v1990_v7 }
 0x4e3   :  { %v1286_v37 = vpop.eup %1285  ;;  %v772_v31 = vadd.f32 %v759_v29, %v1984_v63 }
 0x4e4   :  { %v1288_v51 = vpop.eup %1287  ;;  %v779_v35 = vmul.f32 -1e-06, %v771_v34  ;;  %v761_v6 = vmul.f32 0.6931472, %v1286_v37 }
 0x4e5   :  { %v763_v58 = vmul.f32 0.6931472, %v1288_v51  ;;  %v780_v60 = vmul.f32 -1e-06, %v772_v31 }
 0x4e6   :  { %v865_v38 = vadd.f32 %v779_v35, %v778_v53  ;;  %v773_v0 = vadd.f32 %v761_v6, %v1992_v14 }
 0x4e7   :  { %v1290_v52 = vpop.eup %1289  ;;  %v774_v1 = vadd.f32 %v763_v58, %v1998_v39 }
 0x4e8   :  { %v1292_v36 = vpop.eup %1291  ;;  %v866_v59 = vadd.f32 %v865_v38, %v780_v60  ;;  %v781_v61 = vmul.f32 -1e-06, %v773_v0  ;;  %v765_v5 = vmul.f32 0.6931472, %v1290_v52 }
 0x4e9   :  { %v767_v33 = vmul.f32 0.6931472, %v1292_v36  ;;  %v782_v18 = vmul.f32 -1e-06, %v774_v1 }
 0x4ea   :  { %v867_v7 = vadd.f32 %v866_v59, %v781_v61  ;;  %v775_v63 = vadd.f32 %v765_v5, %v2000_v27 }
 0x4eb   :  { %v1294_v62 = vpop.eup %1293  ;;  %v776_v41 = vadd.f32 %v767_v33, %v2006_v22 }
 0x4ec   :  { %v868_v19 = vadd.f32 %v867_v7, %v782_v18  ;;  %v783_v28 = vmul.f32 -1e-06, %v775_v63  ;;  %v769_v8 = vmul.f32 0.6931472, %v1294_v62 }
 0x4ed   :  { %v784_v14 = vmul.f32 -1e-06, %v776_v41 }
 0x4ee   :  { %v869_v9 = vadd.f32 %v868_v19, %v783_v28  ;;  %v777_v40 = vadd.f32 %v769_v8, %v2008_v11 }
 0x4f0   :  { %v870_v39 = vadd.f32 %v869_v9, %v784_v14  ;;  %v785_v47 = vmul.f32 -1e-06, %v777_v40 }
 0x4f2   :  { %v871_v12 = vadd.f32 %v870_v39, %v785_v47 }
 0x4f4   :  { %v872_v13 = vrot.slane %v871_v12, 4 }
 0x4f6   :  { %v873_v44 = vadd.f32 %v872_v13, %v871_v12 }
 0x4f8   :  { %v874_v56 = vrot.slane %v873_v44, 2 }
 0x4fa   :  { %v875_v43 = vadd.f32 %v874_v56, %v873_v44 }
 0x4fc   :  { %v876_v50 = vrot.slane %v875_v43, 1 }
 0x4fe   :  { %v877_v27 = vadd.f32 %v876_v50, %v875_v43 }
 0x500   :  { %v878_v22 = vmul.f32 0.015625, %v877_v27 }
 0x502   :  { %v886_v48 = vadd.f32 %v885_v17, %v878_v22 }
 0x504   :  { %888 = vst.msk [vmem:[#allocation9] sm:$0x1] %vm887_vm1, %v886_v48 }
 0x505   :  { %1342 = shalt.err (!%p1339_p7)
}
 0x506   :  { %898 = dma.vmem_to_hbm [thread:$0]  %s896_s25, 16, %s2032_s7, [#allocation4]  }
 0x507   :  { %1431 = dma.done.wait [#allocation4], 16  }
 0x508   :  { %1432 = vsyncadd [#allocation4], 4294967280 }
 0x509   :  { %902 = vsyncpa [#allocation4], 1 }
 0x50a   :  { %903 = vsyncpa [#allocation5], 1 }
 0x50b   :  { %904 = vsyncpa [#allocation7], 1 }

</bundles_post_ra>
